<compile_context>
chip_gen: v6e
topology: v6e:2x2x1
jax: 0.10.0
libtpu: 0.0.40
codegen_flags: <defaults>
</compile_context>

<pallas_src>
import functools

import jax
import jax.numpy as jnp
from jax import lax
from jax.experimental import pallas as pl
from jax.experimental.pallas import tpu as pltpu

BN_EPS = 1e-5
_LANE = 128
_VMEM_LIMIT = 32 * 1024 * 1024  # safe on v5e / v6e / v7x scoped VMEM


def _round_up(n, m):
    return ((n + m - 1) // m) * m


def _pick_batch_tile(b):
    # Prefer 512/256-row tiles (full MXU height on v6e/v7x); tail is masked.
    for t in (512, 256, 128, 64, 32, 16, 8):
        if b >= t:
            return t
    return b  # tiny batch: single full-extent block


# -------- pass A: grid=(2, nb) --------------------------------------------
# phase 0: accumulate BN-1 sum/sumsq of h1 = x @ w1 into VMEM scratch
# phase 1: recompute h1, BN1 + PReLU -> inter (HBM), h2 = inter @ w2,
#          accumulate BN-2 sum/sumsq into resident (1, out_pad) outputs.
def _fc1_bn1_fc2_kernel(x_ref, w1_ref, a1_ref, w2_ref,
                        inter_ref, s2_ref, ss2_ref,
                        s1_sc, ss1_sc, *, inv_n, batch, tb, mask_tail):
    p = pl.program_id(0)
    i = pl.program_id(1)

    @pl.when((p == 0) & (i == 0))
    def _():
        s1_sc[...] = jnp.zeros_like(s1_sc)
        ss1_sc[...] = jnp.zeros_like(ss1_sc)

    @pl.when((p == 1) & (i == 0))
    def _():
        s2_ref[...] = jnp.zeros_like(s2_ref)
        ss2_ref[...] = jnp.zeros_like(ss2_ref)

    # bf16 MXU operands, f32 accumulation. Recomputed in both phases; the
    # K=inplanes matmul hides under the x DMA.
    h1 = jnp.dot(x_ref[...], w1_ref[...], preferred_element_type=jnp.float32)

    if mask_tail:
        row = lax.broadcasted_iota(jnp.int32, (tb, 1), 0)
        valid = (i * tb + row) < batch          # (tb, 1) bool row mask
    else:
        valid = None

    @pl.when(p == 0)
    def _():
        h1m = jnp.where(valid, h1, 0.0) if mask_tail else h1
        s1_sc[...] += jnp.sum(h1m, axis=0, keepdims=True)
        ss1_sc[...] += jnp.sum(h1m * h1m, axis=0, keepdims=True)

    @pl.when(p == 1)
    def _():
        # Finalize full-batch BN-1 statistics (biased variance, training mode).
        mu1 = s1_sc[...] * inv_n
        var1 = jnp.maximum(ss1_sc[...] * inv_n - mu1 * mu1, 0.0)
        inv_std1 = lax.rsqrt(var1 + BN_EPS)

        x1 = (h1 - mu1) * inv_std1               # gamma=1, beta=0
        a1 = a1_ref[0]                           # SMEM scalar
        inter = jnp.where(x1 >= 0, x1, a1 * x1)  # PReLU
        inter_ref[...] = inter

        h2 = jnp.dot(inter.astype(jnp.bfloat16), w2_ref[...],
                     preferred_element_type=jnp.float32)
        h2m = jnp.where(valid, h2, 0.0) if mask_tail else h2
        s2_ref[...] += jnp.sum(h2m, axis=0, keepdims=True)
        ss2_ref[...] += jnp.sum(h2m * h2m, axis=0, keepdims=True)


# -------- pass B: recompute h2, BN2 + PReLU + lane-dense softmax ------------
def _bn2_softmax_kernel(inter_ref, s2_ref, ss2_ref, a2_ref, w2_ref, prob_ref,
                        *, inv_n, out_dim):
    # Bit-identical recompute of h2 (inter is stored in f32, cast matches
    # pass A), so the BN-2 stats remain exactly consistent.
    h2 = jnp.dot(inter_ref[...].astype(jnp.bfloat16), w2_ref[...],
                 preferred_element_type=jnp.float32)

    mu2 = s2_ref[...] * inv_n
    var2 = jnp.maximum(ss2_ref[...] * inv_n - mu2 * mu2, 0.0)
    inv_std2 = lax.rsqrt(var2 + BN_EPS)

    x2 = (h2 - mu2) * inv_std2
    a2 = a2_ref[0]
    act = jnp.where(x2 >= 0, x2, a2 * x2)

    if out_dim < act.shape[-1]:
        # lane-padding columns -> effectively -inf logits
        col = lax.broadcasted_iota(jnp.int32, act.shape, dimension=1)
        act = jnp.where(col < out_dim, act, -1e30)

    m = jnp.max(act, axis=1, keepdims=True)
    e = jnp.exp(act - m)
    denom = jnp.sum(e, axis=1, keepdims=True)
    r = pl.reciprocal(denom, approx=True)        # EUP slot
    r = r * (2.0 - denom * r)                    # one Newton step -> f32 accuracy
    prob_ref[...] = (e * r).astype(prob_ref.dtype)


def prepare_gdn_params(w1, w2):
    """One-time parameter prep: bf16 weights, w2 zero-padded to a lane multiple.

    w1: (inplanes, intermediate_dim)  == torch fc1.weight.T
    w2: (intermediate_dim, outplanes) == torch fc2.weight.T
    Linear biases are omitted (mathematically dead under training-mode BN).
    """
    dint, out_dim = w2.shape
    out_pad = _round_up(out_dim, _LANE)
    w1_bf = w1.astype(jnp.bfloat16)
    w2_bf = jnp.zeros((dint, out_pad), jnp.bfloat16).at[:, :out_dim].set(
        w2.astype(jnp.bfloat16))
    return w1_bf, w2_bf


def gdn_forward(x, w1_bf, a1, w2_bf, a2, *, out_dim, batch_tile=None):
    """GDN forward. Returns (intermediate (B, Dint) f32, probs (B, out_dim) f32)."""
    B, inplanes = x.shape
    dint = w1_bf.shape[1]
    out_pad = w2_bf.shape[1]

    tb = batch_tile if batch_tile is not None else _pick_batch_tile(B)
    tb = min(tb, _round_up(B, 8)) if B >= 8 else B
    nb = pl.cdiv(B, tb)
    mask_tail = (B % tb) != 0
    inv_n = 1.0 / B

    x_bf = x.astype(jnp.bfloat16)                 # halve x DMA bytes

    smem = pltpu.MemorySpace.SMEM
    acc_params = pltpu.CompilerParams(
        dimension_semantics=("arbitrary", "arbitrary"),
        vmem_limit_bytes=_VMEM_LIMIT)
    par_params = pltpu.CompilerParams(
        dimension_semantics=("parallel",), vmem_limit_bytes=_VMEM_LIMIT)

    # ---- pass A: stats + normalize + fc2 stats (no h1/h2 HBM traffic) ----
    # inter out_spec uses block index p*i: during phase 0 it stays parked on
    # block 0 (no garbage writebacks); phase 1 writes every block exactly once.
    inter, s2, ss2 = pl.pallas_call(
        functools.partial(_fc1_bn1_fc2_kernel, inv_n=inv_n, batch=B, tb=tb,
                          mask_tail=mask_tail),
        grid=(2, nb),
        in_specs=[
            pl.BlockSpec((tb, inplanes), lambda p, i: (i, 0)),     # x (bf16)
            pl.BlockSpec((inplanes, dint), lambda p, i: (0, 0)),   # w1 (bf16)
            pl.BlockSpec(memory_space=smem),                       # PReLU slope 1
            pl.BlockSpec((dint, out_pad), lambda p, i: (0, 0)),    # w2 (bf16, padded)
        ],
        out_specs=(
            pl.BlockSpec((tb, dint), lambda p, i: (p * i, 0)),     # inter
            pl.BlockSpec((1, out_pad), lambda p, i: (0, 0)),       # sum2
            pl.BlockSpec((1, out_pad), lambda p, i: (0, 0)),       # sumsq2
        ),
        out_shape=(
            jax.ShapeDtypeStruct((B, dint), jnp.float32),
            jax.ShapeDtypeStruct((1, out_pad), jnp.float32),
            jax.ShapeDtypeStruct((1, out_pad), jnp.float32),
        ),
        scratch_shapes=[
            pltpu.VMEM((1, dint), jnp.float32),                    # sum1
            pltpu.VMEM((1, dint), jnp.float32),                    # sumsq1
        ],
        compiler_params=acc_params,
    )(x_bf, w1_bf, a1, w2_bf)

    # ---- pass B: BN2 + PReLU + softmax (recompute h2 from inter) ----
    prob_pad = pl.pallas_call(
        functools.partial(_bn2_softmax_kernel, inv_n=inv_n, out_dim=out_dim),
        grid=(nb,),
        in_specs=[
            pl.BlockSpec((tb, dint), lambda i: (i, 0)),            # inter
            pl.BlockSpec((1, out_pad), lambda i: (0, 0)),          # sum2
            pl.BlockSpec((1, out_pad), lambda i: (0, 0)),          # sumsq2
            pl.BlockSpec(memory_space=smem),                       # PReLU slope 2
            pl.BlockSpec((dint, out_pad), lambda i: (0, 0)),       # w2 (bf16, padded)
        ],
        out_specs=pl.BlockSpec((tb, out_pad), lambda i: (i, 0)),
        out_shape=jax.ShapeDtypeStruct((B, out_pad), jnp.float32),
        compiler_params=par_params,
    )(inter, s2, ss2, a2, w2_bf)

    prob = prob_pad[:, :out_dim]
    return inter, prob


# ---------------- reference & demo ----------------
def _xavier_normal(key, out_features, in_features):
    std = (2.0 / (in_features + out_features)) ** 0.5
    return std * jax.random.normal(key, (out_features, in_features), jnp.float32)


def _reference(x, w1, w2, a1, a2, *, matmul_dtype=jnp.float32):
    def fc(h_in, w, a):
        h = jnp.dot(h_in.astype(matmul_dtype), w.astype(matmul_dtype),
                    preferred_element_type=jnp.float32)
        mu = jnp.mean(h, axis=0, keepdims=True)
        var = jnp.mean((h - mu) ** 2, axis=0, keepdims=True)
        hn = (h - mu) / jnp.sqrt(var + BN_EPS)
        return jnp.where(hn >= 0, hn, a[0] * hn)

    inter = fc(x, w1, a1)
    out = fc(inter, w2, a2)
    return inter, jax.nn.softmax(out, axis=1)


if __name__ == "__main__":
    B, inplanes, intermediate_dim, outplanes = 64, 64, 256, 8

    key = jax.random.PRNGKey(0)
    kx, kw1, kw2 = jax.random.split(key, 3)

    x = jax.random.normal(kx, (B, inplanes), jnp.float32)

    # PyTorch init_weight(): Linear weight xavier_normal_, bias 0 (dropped: dead
    # under BN), BN gamma=1 / beta=0 (pure normalization), PReLU slope 0.25.
    w1 = _xavier_normal(kw1, intermediate_dim, inplanes).T   # (in, inter)
    w2 = _xavier_normal(kw2, outplanes, intermediate_dim).T  # (inter, out)
    a1 = jnp.full((1,), 0.25, jnp.float32)
    a2 = jnp.full((1,), 0.25, jnp.float32)

    # One-time weight prep (bf16 + lane padding), hoisted out of the forward.
    w1_bf, w2_bf = prepare_gdn_params(w1, w2)

    fwd = jax.jit(gdn_forward, static_argnames=("out_dim", "batch_tile"))
    # batch_tile=24 with B=64 -> grid of 3 tiles with a masked tail tile,
    # exercising the cross-tile BN reduction and the tail mask. (Real runs
    # should leave batch_tile=None -> 256-512 row tiles.)
    inter, prob = fwd(x, w1_bf, a1, w2_bf, a2, out_dim=outplanes, batch_tile=24)
    jax.block_until_ready((inter, prob))

    assert inter.shape == (B, intermediate_dim)
    assert prob.shape == (B, outplanes)

    # Matched-precision reference (bf16 MXU operands, f32 accumulation/epilogue).
    ref_inter, ref_prob = _reference(x, w1, w2, a1, a2, matmul_dtype=jnp.bfloat16)
    assert jnp.allclose(inter, ref_inter, atol=5e-3, rtol=0.0)
    assert jnp.allclose(prob, ref_prob, atol=5e-3, rtol=0.0)

    # Sanity check vs pure-f32 semantics of the PyTorch module.
    f32_inter, f32_prob = _reference(x, w1, w2, a1, a2, matmul_dtype=jnp.float32)
    assert jnp.allclose(inter, f32_inter, atol=5e-2, rtol=0.0)
    assert jnp.allclose(prob, f32_prob, atol=1e-1, rtol=0.0)
    assert jnp.allclose(jnp.sum(prob, axis=1), 1.0, atol=1e-5)

    print("KERNEL_OK")
</pallas_src>

<mosaic_0001>
module attributes {stable_mosaic.version = 11 : i64} {
  func.func @_bn2_softmax_kernel(%arg0: i32, %arg1: memref<24x256xf32, #tpu.memory_space<vmem>>, %arg2: memref<1x128xf32, #tpu.memory_space<vmem>>, %arg3: memref<1x128xf32, #tpu.memory_space<vmem>>, %arg4: memref<1xf32, #tpu.memory_space<smem>>, %arg5: memref<256x128xbf16, #tpu.memory_space<vmem>>, %arg6: memref<24x128xf32, #tpu.memory_space<vmem>>) attributes {dimension_semantics = [#tpu.dimension_semantics<parallel>], iteration_bounds = array<i64: 3>, scalar_prefetch = 0 : i64, scratch_operands = 0 : i64, tpu.core_type = #tpu.core_type<tc>, window_params = [{transform_indices = @transform_0, window_bounds = array<i64: 24, 256>}, {pipeline_mode = #tpu.pipeline_mode<synchronous>, transform_indices = @transform_1, window_bounds = array<i64: 1, 128>}, {pipeline_mode = #tpu.pipeline_mode<synchronous>, transform_indices = @transform_2, window_bounds = array<i64: 1, 128>}, {transform_indices = @transform_3, window_bounds = array<i64: 1>}, {pipeline_mode = #tpu.pipeline_mode<synchronous>, transform_indices = @transform_4, window_bounds = array<i64: 256, 128>}, {transform_indices = @transform_5, window_bounds = array<i64: 24, 128>}]} {
    %c0 = arith.constant 0 : index
    %c0_0 = arith.constant 0 : index
    %0 = vector.load %arg1[%c0, %c0_0] : memref<24x256xf32, #tpu.memory_space<vmem>>, vector<24x256xf32>
    %1 = arith.truncf %0 : vector<24x256xf32> to vector<24x256xbf16>
    %c0_1 = arith.constant 0 : index
    %c0_2 = arith.constant 0 : index
    %2 = vector.load %arg5[%c0_1, %c0_2] : memref<256x128xbf16, #tpu.memory_space<vmem>>, vector<256x128xbf16>
    %cst = arith.constant dense<0.000000e+00> : vector<24x128xf32>
    %3 = tpu.matmul %1, %2, %cst {dimension_numbers = #tpu.dot_dimension_numbers<[1], [0], [0], [1], [0, 0, 1, 1], [], []>} : vector<24x256xbf16>, vector<256x128xbf16>, vector<24x128xf32> -> vector<24x128xf32>
    %c0_3 = arith.constant 0 : index
    %c0_4 = arith.constant 0 : index
    %4 = vector.load %arg2[%c0_3, %c0_4] : memref<1x128xf32, #tpu.memory_space<vmem>>, vector<1x128xf32>
    %cst_5 = arith.constant 1.562500e-02 : f32
    %5 = vector.broadcast %cst_5 : f32 to vector<1x128xf32>
    %6 = arith.mulf %4, %5 : vector<1x128xf32>
    %c0_6 = arith.constant 0 : index
    %c0_7 = arith.constant 0 : index
    %7 = vector.load %arg3[%c0_6, %c0_7] : memref<1x128xf32, #tpu.memory_space<vmem>>, vector<1x128xf32>
    %cst_8 = arith.constant 1.562500e-02 : f32
    %8 = vector.broadcast %cst_8 : f32 to vector<1x128xf32>
    %9 = arith.mulf %7, %8 : vector<1x128xf32>
    %10 = arith.mulf %6, %6 : vector<1x128xf32>
    %11 = arith.subf %9, %10 : vector<1x128xf32>
    %cst_9 = arith.constant 0.000000e+00 : f32
    %12 = vector.broadcast %cst_9 : f32 to vector<1x128xf32>
    %13 = arith.maximumf %11, %12 : vector<1x128xf32>
    %cst_10 = arith.constant 9.99999974E-6 : f32
    %14 = vector.broadcast %cst_10 : f32 to vector<1x128xf32>
    %15 = arith.addf %13, %14 : vector<1x128xf32>
    %16 = math.rsqrt %15 : vector<1x128xf32>
    %17 = vector.broadcast %6 : vector<1x128xf32> to vector<24x128xf32>
    %18 = arith.subf %3, %17 : vector<24x128xf32>
    %19 = vector.broadcast %16 : vector<1x128xf32> to vector<24x128xf32>
    %20 = arith.mulf %18, %19 : vector<24x128xf32>
    %c0_11 = arith.constant 0 : index
    %21 = memref.load %arg4[%c0_11] : memref<1xf32, #tpu.memory_space<smem>>
    %cst_12 = arith.constant 0.000000e+00 : f32
    %22 = vector.broadcast %cst_12 : f32 to vector<24x128xf32>
    %23 = arith.cmpf oge, %20, %22 : vector<24x128xf32>
    %24 = vector.broadcast %21 : f32 to vector<24x128xf32>
    %25 = arith.mulf %24, %20 : vector<24x128xf32>
    %26 = arith.select %23, %20, %25 : vector<24x128xi1>, vector<24x128xf32>
    %27 = tpu.iota {dimensions = array<i32: 1>} : vector<24x128xi32>
    %c8_i32 = arith.constant 8 : i32
    %28 = vector.broadcast %c8_i32 : i32 to vector<24x128xi32>
    %29 = arith.cmpi slt, %27, %28 : vector<24x128xi32>
    %cst_13 = arith.constant -1.000000e+30 : f32
    %30 = vector.broadcast %cst_13 : f32 to vector<24x128xf32>
    %31 = arith.select %29, %26, %30 : vector<24x128xi1>, vector<24x128xf32>
    %cst_14 = arith.constant dense<0xFF800000> : vector<24xf32>
    %32 = vector.multi_reduction <maximumf>, %31, %cst_14 [1] : vector<24x128xf32> to vector<24xf32>
    %33 = vector.shape_cast %32 : vector<24xf32> to vector<24x1xf32>
    %34 = vector.broadcast %33 : vector<24x1xf32> to vector<24x128xf32>
    %35 = arith.subf %31, %34 : vector<24x128xf32>
    %36 = math.exp %35 : vector<24x128xf32>
    %cst_15 = arith.constant dense<0.000000e+00> : vector<24xf32>
    %37 = vector.multi_reduction <add>, %36, %cst_15 [1] : vector<24x128xf32> to vector<24xf32>
    %38 = vector.shape_cast %37 : vector<24xf32> to vector<24x1xf32>
    %39 = tpu.reciprocal %38 {approx = true} : vector<24x1xf32> -> vector<24x1xf32>
    %40 = arith.mulf %38, %39 : vector<24x1xf32>
    %cst_16 = arith.constant 2.000000e+00 : f32
    %41 = vector.broadcast %cst_16 : f32 to vector<24x1xf32>
    %42 = arith.subf %41, %40 : vector<24x1xf32>
    %43 = arith.mulf %39, %42 : vector<24x1xf32>
    %44 = vector.broadcast %43 : vector<24x1xf32> to vector<24x128xf32>
    %45 = arith.mulf %36, %44 : vector<24x128xf32>
    %c0_17 = arith.constant 0 : index
    %c0_18 = arith.constant 0 : index
    %46 = vector.load %arg6[%c0_17, %c0_18] : memref<24x128xf32, #tpu.memory_space<vmem>>, vector<24x128xf32>
    tpu.vector_store %arg6[%c0_17, %c0_18], %45 {strides = array<i32>} : memref<24x128xf32, #tpu.memory_space<vmem>>, vector<24x128xf32>,
    return
  }
  func.func @transform_0(%arg0: i32) -> (i32, i32) {
    %c0_i32 = arith.constant 0 : i32
    %c0_i32_0 = arith.constant 0 : i32
    return %arg0, %c0_i32 : i32, i32
  }
  func.func @transform_1(%arg0: i32) -> (i32, i32) {
    %c0_i32 = arith.constant 0 : i32
    %c0_i32_0 = arith.constant 0 : i32
    %c0_i32_1 = arith.constant 0 : i32
    return %c0_i32, %c0_i32_0 : i32, i32
  }
  func.func @transform_2(%arg0: i32) -> (i32, i32) {
    %c0_i32 = arith.constant 0 : i32
    %c0_i32_0 = arith.constant 0 : i32
    %c0_i32_1 = arith.constant 0 : i32
    return %c0_i32, %c0_i32_0 : i32, i32
  }
  func.func @transform_3(%arg0: i32) -> i32 {
    %c0_i32 = arith.constant 0 : i32
    %c0_i32_0 = arith.constant 0 : i32
    return %c0_i32 : i32
  }
  func.func @transform_4(%arg0: i32) -> (i32, i32) {
    %c0_i32 = arith.constant 0 : i32
    %c0_i32_0 = arith.constant 0 : i32
    %c0_i32_1 = arith.constant 0 : i32
    return %c0_i32, %c0_i32_0 : i32, i32
  }
  func.func @transform_5(%arg0: i32) -> (i32, i32) {
    %c0_i32 = arith.constant 0 : i32
    %c0_i32_0 = arith.constant 0 : i32
    return %arg0, %c0_i32 : i32, i32
  }
}

module attributes {stable_mosaic.version = 11 : i64} {
  func.func @_fc1_bn1_fc2_kernel(%arg0: i32, %arg1: i32, %arg2: memref<24x64xbf16, #tpu.memory_space<vmem>>, %arg3: memref<64x256xbf16, #tpu.memory_space<vmem>>, %arg4: memref<1xf32, #tpu.memory_space<smem>>, %arg5: memref<256x128xbf16, #tpu.memory_space<vmem>>, %arg6: memref<24x256xf32, #tpu.memory_space<vmem>>, %arg7: memref<1x128xf32, #tpu.memory_space<vmem>>, %arg8: memref<1x128xf32, #tpu.memory_space<vmem>>, %arg9: memref<1x256xf32, #tpu.memory_space<vmem>>, %arg10: memref<1x256xf32, #tpu.memory_space<vmem>>) attributes {dimension_semantics = [#tpu.dimension_semantics<arbitrary>, #tpu.dimension_semantics<arbitrary>], iteration_bounds = array<i64: 2, 3>, scalar_prefetch = 0 : i64, scratch_operands = 2 : i64, tpu.core_type = #tpu.core_type<tc>, window_params = [{transform_indices = @transform_0, window_bounds = array<i64: 24, 64>}, {pipeline_mode = #tpu.pipeline_mode<synchronous>, transform_indices = @transform_1, window_bounds = array<i64: 64, 256>}, {transform_indices = @transform_2, window_bounds = array<i64: 1>}, {pipeline_mode = #tpu.pipeline_mode<synchronous>, transform_indices = @transform_3, window_bounds = array<i64: 256, 128>}, {transform_indices = @transform_4, window_bounds = array<i64: 24, 256>}, {pipeline_mode = #tpu.pipeline_mode<synchronous>, transform_indices = @transform_5, window_bounds = array<i64: 1, 128>}, {pipeline_mode = #tpu.pipeline_mode<synchronous>, transform_indices = @transform_6, window_bounds = array<i64: 1, 128>}]} {
    %c0_i32 = arith.constant 0 : i32
    %0 = arith.cmpi eq, %arg0, %c0_i32 : i32
    %c0_i32_0 = arith.constant 0 : i32
    %1 = arith.cmpi eq, %arg1, %c0_i32_0 : i32
    %2 = arith.andi %0, %1 : i1
    %3 = arith.extui %2 : i1 to i32
    %c0_i32_1 = arith.constant 0 : i32
    %4 = arith.cmpi ne, %3, %c0_i32_1 : i32
    scf.if %4 {
      %cst_11 = arith.constant 0.000000e+00 : f32
      %25 = vector.broadcast %cst_11 : f32 to vector<1x256xf32>
      %c0_12 = arith.constant 0 : index
      %c0_13 = arith.constant 0 : index
      %26 = vector.load %arg9[%c0_12, %c0_13] : memref<1x256xf32, #tpu.memory_space<vmem>>, vector<1x256xf32>
      tpu.vector_store %arg9[%c0_12, %c0_13], %25 {strides = array<i32>} : memref<1x256xf32, #tpu.memory_space<vmem>>, vector<1x256xf32>,
      %cst_14 = arith.constant 0.000000e+00 : f32
      %27 = vector.broadcast %cst_14 : f32 to vector<1x256xf32>
      %c0_15 = arith.constant 0 : index
      %c0_16 = arith.constant 0 : index
      %28 = vector.load %arg10[%c0_15, %c0_16] : memref<1x256xf32, #tpu.memory_space<vmem>>, vector<1x256xf32>
      tpu.vector_store %arg10[%c0_15, %c0_16], %27 {strides = array<i32>} : memref<1x256xf32, #tpu.memory_space<vmem>>, vector<1x256xf32>,
    } else {
    }
    %c1_i32 = arith.constant 1 : i32
    %5 = arith.cmpi eq, %arg0, %c1_i32 : i32
    %c0_i32_2 = arith.constant 0 : i32
    %6 = arith.cmpi eq, %arg1, %c0_i32_2 : i32
    %7 = arith.andi %5, %6 : i1
    %8 = arith.extui %7 : i1 to i32
    %c0_i32_3 = arith.constant 0 : i32
    %9 = arith.cmpi ne, %8, %c0_i32_3 : i32
    scf.if %9 {
      %cst_11 = arith.constant 0.000000e+00 : f32
      %25 = vector.broadcast %cst_11 : f32 to vector<1x128xf32>
      %c0_12 = arith.constant 0 : index
      %c0_13 = arith.constant 0 : index
      %26 = vector.load %arg7[%c0_12, %c0_13] : memref<1x128xf32, #tpu.memory_space<vmem>>, vector<1x128xf32>
      tpu.vector_store %arg7[%c0_12, %c0_13], %25 {strides = array<i32>} : memref<1x128xf32, #tpu.memory_space<vmem>>, vector<1x128xf32>,
      %cst_14 = arith.constant 0.000000e+00 : f32
      %27 = vector.broadcast %cst_14 : f32 to vector<1x128xf32>
      %c0_15 = arith.constant 0 : index
      %c0_16 = arith.constant 0 : index
      %28 = vector.load %arg8[%c0_15, %c0_16] : memref<1x128xf32, #tpu.memory_space<vmem>>, vector<1x128xf32>
      tpu.vector_store %arg8[%c0_15, %c0_16], %27 {strides = array<i32>} : memref<1x128xf32, #tpu.memory_space<vmem>>, vector<1x128xf32>,
    } else {
    }
    %c0 = arith.constant 0 : index
    %c0_4 = arith.constant 0 : index
    %10 = vector.load %arg2[%c0, %c0_4] : memref<24x64xbf16, #tpu.memory_space<vmem>>, vector<24x64xbf16>
    %c0_5 = arith.constant 0 : index
    %c0_6 = arith.constant 0 : index
    %11 = vector.load %arg3[%c0_5, %c0_6] : memref<64x256xbf16, #tpu.memory_space<vmem>>, vector<64x256xbf16>
    %cst = arith.constant dense<0.000000e+00> : vector<24x256xf32>
    %12 = tpu.matmul %10, %11, %cst {dimension_numbers = #tpu.dot_dimension_numbers<[1], [0], [0], [1], [0, 0, 1, 1], [], []>} : vector<24x64xbf16>, vector<64x256xbf16>, vector<24x256xf32> -> vector<24x256xf32>
    %13 = tpu.iota {dimensions = array<i32: 0>} : vector<24x1xi32>
    %c24_i32 = arith.constant 24 : i32
    %14 = arith.muli %arg1, %c24_i32 : i32
    %15 = vector.broadcast %14 : i32 to vector<24x1xi32>
    %16 = arith.addi %15, %13 : vector<24x1xi32>
    %c64_i32 = arith.constant 64 : i32
    %17 = vector.broadcast %c64_i32 : i32 to vector<24x1xi32>
    %18 = arith.cmpi slt, %16, %17 : vector<24x1xi32>
    %c0_i32_7 = arith.constant 0 : i32
    %19 = arith.cmpi eq, %arg0, %c0_i32_7 : i32
    %20 = arith.extui %19 : i1 to i32
    %c0_i32_8 = arith.constant 0 : i32
    %21 = arith.cmpi ne, %20, %c0_i32_8 : i32
    scf.if %21 {
      %cst_11 = arith.constant 0.000000e+00 : f32
      %25 = vector.shape_cast %18 : vector<24x1xi1> to vector<24x1xi1>
      %26 = vector.broadcast %25 : vector<24x1xi1> to vector<24x256xi1>
      %27 = vector.broadcast %cst_11 : f32 to vector<24x256xf32>
      %28 = arith.select %26, %12, %27 : vector<24x256xi1>, vector<24x256xf32>
      %c0_12 = arith.constant 0 : index
      %c0_13 = arith.constant 0 : index
      %29 = vector.load %arg9[%c0_12, %c0_13] : memref<1x256xf32, #tpu.memory_space<vmem>>, vector<1x256xf32>
      %cst_14 = arith.constant dense<0.000000e+00> : vector<256xf32>
      %30 = vector.multi_reduction <add>, %28, %cst_14 [0] : vector<24x256xf32> to vector<256xf32>
      %31 = vector.shape_cast %30 : vector<256xf32> to vector<1x256xf32>
      %32 = arith.addf %29, %31 : vector<1x256xf32>
      %c0_15 = arith.constant 0 : index
      %c0_16 = arith.constant 0 : index
      %33 = vector.load %arg9[%c0_15, %c0_16] : memref<1x256xf32, #tpu.memory_space<vmem>>, vector<1x256xf32>
      tpu.vector_store %arg9[%c0_15, %c0_16], %32 {strides = array<i32>} : memref<1x256xf32, #tpu.memory_space<vmem>>, vector<1x256xf32>,
      %c0_17 = arith.constant 0 : index
      %c0_18 = arith.constant 0 : index
      %34 = vector.load %arg10[%c0_17, %c0_18] : memref<1x256xf32, #tpu.memory_space<vmem>>, vector<1x256xf32>
      %35 = arith.mulf %28, %28 : vector<24x256xf32>
      %cst_19 = arith.constant dense<0.000000e+00> : vector<256xf32>
      %36 = vector.multi_reduction <add>, %35, %cst_19 [0] : vector<24x256xf32> to vector<256xf32>
      %37 = vector.shape_cast %36 : vector<256xf32> to vector<1x256xf32>
      %38 = arith.addf %34, %37 : vector<1x256xf32>
      %c0_20 = arith.constant 0 : index
      %c0_21 = arith.constant 0 : index
      %39 = vector.load %arg10[%c0_20, %c0_21] : memref<1x256xf32, #tpu.memory_space<vmem>>, vector<1x256xf32>
      tpu.vector_store %arg10[%c0_20, %c0_21], %38 {strides = array<i32>} : memref<1x256xf32, #tpu.memory_space<vmem>>, vector<1x256xf32>,
    } else {
    }
    %c1_i32_9 = arith.constant 1 : i32
    %22 = arith.cmpi eq, %arg0, %c1_i32_9 : i32
    %23 = arith.extui %22 : i1 to i32
    %c0_i32_10 = arith.constant 0 : i32
    %24 = arith.cmpi ne, %23, %c0_i32_10 : i32
    scf.if %24 {
      %c0_11 = arith.constant 0 : index
      %c0_12 = arith.constant 0 : index
      %25 = vector.load %arg9[%c0_11, %c0_12] : memref<1x256xf32, #tpu.memory_space<vmem>>, vector<1x256xf32>
      %cst_13 = arith.constant 1.562500e-02 : f32
      %26 = vector.broadcast %cst_13 : f32 to vector<1x256xf32>
      %27 = arith.mulf %25, %26 : vector<1x256xf32>
      %c0_14 = arith.constant 0 : index
      %c0_15 = arith.constant 0 : index
      %28 = vector.load %arg10[%c0_14, %c0_15] : memref<1x256xf32, #tpu.memory_space<vmem>>, vector<1x256xf32>
      %cst_16 = arith.constant 1.562500e-02 : f32
      %29 = vector.broadcast %cst_16 : f32 to vector<1x256xf32>
      %30 = arith.mulf %28, %29 : vector<1x256xf32>
      %31 = arith.mulf %27, %27 : vector<1x256xf32>
      %32 = arith.subf %30, %31 : vector<1x256xf32>
      %cst_17 = arith.constant 0.000000e+00 : f32
      %33 = vector.broadcast %cst_17 : f32 to vector<1x256xf32>
      %34 = arith.maximumf %32, %33 : vector<1x256xf32>
      %cst_18 = arith.constant 9.99999974E-6 : f32
      %35 = vector.broadcast %cst_18 : f32 to vector<1x256xf32>
      %36 = arith.addf %34, %35 : vector<1x256xf32>
      %37 = math.rsqrt %36 : vector<1x256xf32>
      %38 = vector.broadcast %27 : vector<1x256xf32> to vector<24x256xf32>
      %39 = arith.subf %12, %38 : vector<24x256xf32>
      %40 = vector.broadcast %37 : vector<1x256xf32> to vector<24x256xf32>
      %41 = arith.mulf %39, %40 : vector<24x256xf32>
      %c0_19 = arith.constant 0 : index
      %42 = memref.load %arg4[%c0_19] : memref<1xf32, #tpu.memory_space<smem>>
      %cst_20 = arith.constant 0.000000e+00 : f32
      %43 = vector.broadcast %cst_20 : f32 to vector<24x256xf32>
      %44 = arith.cmpf oge, %41, %43 : vector<24x256xf32>
      %45 = vector.broadcast %42 : f32 to vector<24x256xf32>
      %46 = arith.mulf %45, %41 : vector<24x256xf32>
      %47 = arith.select %44, %41, %46 : vector<24x256xi1>, vector<24x256xf32>
      %c0_21 = arith.constant 0 : index
      %c0_22 = arith.constant 0 : index
      %48 = vector.load %arg6[%c0_21, %c0_22] : memref<24x256xf32, #tpu.memory_space<vmem>>, vector<24x256xf32>
      tpu.vector_store %arg6[%c0_21, %c0_22], %47 {strides = array<i32>} : memref<24x256xf32, #tpu.memory_space<vmem>>, vector<24x256xf32>,
      %49 = arith.truncf %47 : vector<24x256xf32> to vector<24x256xbf16>
      %c0_23 = arith.constant 0 : index
      %c0_24 = arith.constant 0 : index
      %50 = vector.load %arg5[%c0_23, %c0_24] : memref<256x128xbf16, #tpu.memory_space<vmem>>, vector<256x128xbf16>
      %cst_25 = arith.constant dense<0.000000e+00> : vector<24x128xf32>
      %51 = tpu.matmul %49, %50, %cst_25 {dimension_numbers = #tpu.dot_dimension_numbers<[1], [0], [0], [1], [0, 0, 1, 1], [], []>} : vector<24x256xbf16>, vector<256x128xbf16>, vector<24x128xf32> -> vector<24x128xf32>
      %cst_26 = arith.constant 0.000000e+00 : f32
      %52 = vector.shape_cast %18 : vector<24x1xi1> to vector<24x1xi1>
      %53 = vector.broadcast %52 : vector<24x1xi1> to vector<24x128xi1>
      %54 = vector.broadcast %cst_26 : f32 to vector<24x128xf32>
      %55 = arith.select %53, %51, %54 : vector<24x128xi1>, vector<24x128xf32>
      %c0_27 = arith.constant 0 : index
      %c0_28 = arith.constant 0 : index
      %56 = vector.load %arg7[%c0_27, %c0_28] : memref<1x128xf32, #tpu.memory_space<vmem>>, vector<1x128xf32>
      %cst_29 = arith.constant dense<0.000000e+00> : vector<128xf32>
      %57 = vector.multi_reduction <add>, %55, %cst_29 [0] : vector<24x128xf32> to vector<128xf32>
      %58 = vector.shape_cast %57 : vector<128xf32> to vector<1x128xf32>
      %59 = arith.addf %56, %58 : vector<1x128xf32>
      %c0_30 = arith.constant 0 : index
      %c0_31 = arith.constant 0 : index
      %60 = vector.load %arg7[%c0_30, %c0_31] : memref<1x128xf32, #tpu.memory_space<vmem>>, vector<1x128xf32>
      tpu.vector_store %arg7[%c0_30, %c0_31], %59 {strides = array<i32>} : memref<1x128xf32, #tpu.memory_space<vmem>>, vector<1x128xf32>,
      %c0_32 = arith.constant 0 : index
      %c0_33 = arith.constant 0 : index
      %61 = vector.load %arg8[%c0_32, %c0_33] : memref<1x128xf32, #tpu.memory_space<vmem>>, vector<1x128xf32>
      %62 = arith.mulf %55, %55 : vector<24x128xf32>
      %cst_34 = arith.constant dense<0.000000e+00> : vector<128xf32>
      %63 = vector.multi_reduction <add>, %62, %cst_34 [0] : vector<24x128xf32> to vector<128xf32>
      %64 = vector.shape_cast %63 : vector<128xf32> to vector<1x128xf32>
      %65 = arith.addf %61, %64 : vector<1x128xf32>
      %c0_35 = arith.constant 0 : index
      %c0_36 = arith.constant 0 : index
      %66 = vector.load %arg8[%c0_35, %c0_36] : memref<1x128xf32, #tpu.memory_space<vmem>>, vector<1x128xf32>
      tpu.vector_store %arg8[%c0_35, %c0_36], %65 {strides = array<i32>} : memref<1x128xf32, #tpu.memory_space<vmem>>, vector<1x128xf32>,
    } else {
    }
    return
  }
  func.func @transform_0(%arg0: i32, %arg1: i32) -> (i32, i32) {
    %c0_i32 = arith.constant 0 : i32
    %c0_i32_0 = arith.constant 0 : i32
    return %arg1, %c0_i32 : i32, i32
  }
  func.func @transform_1(%arg0: i32, %arg1: i32) -> (i32, i32) {
    %c0_i32 = arith.constant 0 : i32
    %c0_i32_0 = arith.constant 0 : i32
    %c0_i32_1 = arith.constant 0 : i32
    return %c0_i32, %c0_i32_0 : i32, i32
  }
  func.func @transform_2(%arg0: i32, %arg1: i32) -> i32 {
    %c0_i32 = arith.constant 0 : i32
    %c0_i32_0 = arith.constant 0 : i32
    return %c0_i32 : i32
  }
  func.func @transform_3(%arg0: i32, %arg1: i32) -> (i32, i32) {
    %c0_i32 = arith.constant 0 : i32
    %c0_i32_0 = arith.constant 0 : i32
    %c0_i32_1 = arith.constant 0 : i32
    return %c0_i32, %c0_i32_0 : i32, i32
  }
  func.func @transform_4(%arg0: i32, %arg1: i32) -> (i32, i32) {
    %0 = arith.muli %arg0, %arg1 : i32
    %c0_i32 = arith.constant 0 : i32
    %c0_i32_0 = arith.constant 0 : i32
    return %0, %c0_i32 : i32, i32
  }
  func.func @transform_5(%arg0: i32, %arg1: i32) -> (i32, i32) {
    %c0_i32 = arith.constant 0 : i32
    %c0_i32_0 = arith.constant 0 : i32
    %c0_i32_1 = arith.constant 0 : i32
    return %c0_i32, %c0_i32_0 : i32, i32
  }
  func.func @transform_6(%arg0: i32, %arg1: i32) -> (i32, i32) {
    %c0_i32 = arith.constant 0 : i32
    %c0_i32_0 = arith.constant 0 : i32
    %c0_i32_1 = arith.constant 0 : i32
    return %c0_i32, %c0_i32_0 : i32, i32
  }
}

</mosaic_0001>

<bundles_post_ra>
// kernel: gdn_forward.3
= control target key start
LH: loop header
LB: loop body
LE: loop exit
PB: predicated region body
PF: predicated region fallthrough
CT: control target
= control target key end

     0   :  { %s1220_s0 = inlined_call_operand.vmem [shape: f32[64,256], index: 0, kind: input, shape index: {}]   ;;  %s1221_s1 = inlined_call_operand.vmem [shape: f32[1,128], index: 1, kind: input, shape index: {}]   ;;  %s1222_s2 = inlined_call_operand.vmem [shape: f32[1,128], index: 2, kind: input, shape index: {}]   ;;  %s1223_s3 = inlined_call_operand.<no memory space> [shape: f32[1], index: 3, kind: input, shape index: {}]   ;;  %s1224_s4 = inlined_call_operand.vmem [shape: bf16[256,128], index: 4, kind: input, shape index: {}]   ;;  %s1225_s5 = inlined_call_operand.vmem [shape: f32[64,128], index: 5, kind: output, shape index: {}]  }
   0x1   :  { %10 = sst [smem:[#allocation2]] %s1223_s3 }
   0x2   :  { %s1076_s20 = smov 0   ;;  %s1078_s21 = smov 0  }
   0x3   :  { %s1080_s22 = smov 0  }
   0x4 LB: > { %s1089_s3 = sadd.s32 4294967295, %s1009_s22   ;;  %s1091_s23 = sadd.s32 1, %s1009_s22   ;;  %s1009_s22 = sphi %s1080_s22, %s1229_s22   ;;  %s1005_s21 = sphi %s1078_s21, %s1228_s21   ;;  %s1001_s20 = sphi %s1076_s20, %s1227_s20  }
   0x5   : > { %s130_s24 = ssub.s32 %s1009_s22, %s1091_s23  ;;  %s133_s25 = sadd.s32 1, %s1005_s21 }
   0x6   : > { %p131_p0 = scmp.eq.s32.totalorder %s130_s24, 0  ;;  %p143_p1 = scmp.ne.s32.totalorder %s1005_s21, %s1001_s20 }
   0x7   : > { %p144_p2 = scmp.eq.s32.totalorder %s1089_s3, 2  ;;  %p754_p3 = scmp.ge.s32.totalorder %s1009_s22, 1 }
   0x8   : > { %s1099_s26 = scalar_select %p131_p0, %s1005_s21, %s133_s25  }
   0x9   : > { %p1101_p4 = por %p144_p2, %p143_p1  ;;  %p200_p5 = scmp.lt.s32.totalorder %s1009_s22, 4 }
   0xb   : > { %p201_p6 = pnand %p754_p3, %p200_p5 }
   0xc   : > { %s1109_s30 = smul.u32 (!%p201_p6), 3, %s1089_s3  ;;  %s230_s8 = sand.u32 (!%p201_p6), 1, %s1001_s20  }
   0xd   : > { %204 = sbr.rel (%p201_p6) target bundleno = 632 (0x278), region = 40 }
   0xe   : > { %p239_p7 = scmp.lt.s32.totalorder (!%p201_p6), %s1109_s30, 7  ;;  %s831_s9 = smul.u32 (!%p201_p6), 24, %s230_s8 }
  0x10   : > { %s1179_s10 = scalar_lea.vmem (!%p201_p6), [#allocation3], %s831_s9  }
  0x12   : > { %v921_v0 = vld [vmem:[%s1224_s4 + $0x78] sm:$0xff]   ;;  %v923_v2 = vld [vmem:[%s1224_s4 + $0x70] sm:$0xff]   ;;  %v925_v4 = vld [vmem:[%s1224_s4 + $0x68] sm:$0xff]   ;;  %s240_s14 = scalar_select %p239_p7, %s1109_s30, 7  ;;  %v452_v34 = vlaneseq }
  0x13   : > { %v922_v1 = vld [vmem:[%s1224_s4 + $0x38] sm:$0xff]   ;;  %787 = vmatprep.subr.bf16.mxu0 %v921_v0  ;;  %815 = vmatprep.subr.bf16.mxu1 %v921_v0  ;;  %v924_v3 = vld [vmem:[%s1224_s4 + $0x30] sm:$0xff]   ;;  %v926_v5 = vld [vmem:[%s1224_s4 + $0x28] sm:$0xff]   ;;  %s533_s20 = ssub.s32 (%p1101_p4), 8, %s1109_s30  ;;  %s786_s11 = smul.u32 (%p1101_p4), 24, %s1089_s3 }
  0x14   : > { %788 = vmatpush3.bf16.msra.mxu0 %v922_v1  ;;  %823 = vmatpush3.bf16.msra.mxu1 %v922_v1  ;;  %v927_v6 = vld [vmem:[%s1224_s4 + $0x60] sm:$0xff]   ;;  %s785_s19 = sshll.u32 %s240_s14, 4  ;;  %v929_v8 = vld [vmem:[%s1224_s4 + $0x58] sm:$0xff]   ;;  %v931_v10 = vld [vmem:[%s1224_s4 + $0x50] sm:$0xff]   ;;  %v453_v35 = vshrl.u32 %v452_v34, 7  ;;  %v481_v48 = vand.u32 127, %v452_v34 }
  0x15   : > { %789 = vmatprep.subr.bf16.mxu0 %v923_v2  ;;  %816 = vmatprep.subr.bf16.mxu1 %v923_v2  ;;  %v928_v7 = vld [vmem:[%s1224_s4 + $0x20] sm:$0xff]   ;;  %s1140_s7 = scalar_lea.vmem %s1220_s0, %s785_s19  ;;  %v930_v9 = vld [vmem:[%s1224_s4 + $0x18] sm:$0xff]   ;;  %v932_v16 = vld [vmem:[%s1224_s4 + $0x10] sm:$0xff]   ;;  %p534_p8 = scmp.lt.s32.totalorder (%p1101_p4), %s533_s20, 3 }
  0x16   : > { %v257_v11 = vld [vmem:[%s1140_s7 + $0x8] sm:$0xff]  ;;  %v259_v12 = vld [vmem:[%s1140_s7 + $0x18] sm:$0xff]  ;;  %v935_v19 = vld [vmem:[%s1224_s4 + $0x40] sm:$0xff]   ;;  %v454_v36 = vsub.s32 0, %v453_v35  ;;  %vm482_vm0 = vcmp.lt.s32.totalorder %v481_v48, 8  ;;  %s1191_s14 = scalar_lea.vmem (%p1101_p4), %s1225_s5, %s786_s11  }
  0x17   : > { %v261_v13 = vld [vmem:[%s1140_s7 + $0x28] sm:$0xff]  ;;  %v263_v14 = vpack.c.bf16 %v259_v12, %v257_v11  ;;  %v936_v20 = vld [vmem:[%s1224_s4] sm:$0xff]   ;;  %v258_v22 = vld [vmem:[%s1140_s7 + $0x10] sm:$0xff] }
  0x18   : > { %790 = vmatpush3.bf16.msra.mxu0 %v924_v3  ;;  %824 = vmatpush3.bf16.msra.mxu1 %v924_v3  ;;  %v265_v15 = vpack.c.bf16 %v261_v13, %v261_v13  ;;  %v933_v17 = vld [vmem:[%s1224_s4 + $0x48] sm:$0xff]   ;;  %v256_v21 = vld [vmem:[%s1140_s7] sm:$0xff] }
  0x19   : > { %791 = vmatprep.subr.bf16.mxu0 %v925_v4  ;;  %817 = vmatprep.subr.bf16.mxu1 %v925_v4  ;;  %v934_v18 = vld [vmem:[%s1224_s4 + $0x8] sm:$0xff]   ;;  %v260_v23 = vld [vmem:[%s1140_s7 + $0x20] sm:$0xff]  ;;  %v262_v24 = vpack.c.bf16 %v258_v22, %v256_v21  ;;  %s469_s7 = sld [smem:[#allocation2]] }
  0x1a   : > { %426 = vmatprep.mubr.bf16.mxu0 %v263_v14  ;;  %434 = vmatprep.mubr.bf16.mxu1 %v265_v15  ;;  %v264_v25 = vpack.c.bf16 %v260_v23, %v260_v23  ;;  %v442_v26 = vld [vmem:[%s1221_s1] sm:$0x1] }
  0x1b   : > { %v443_v27 = vmul.f32 0.015625, %v442_v26  ;;  %v444_v28 = vld [vmem:[%s1222_s2] sm:$0x1] }
  0x1c   : > { %792 = vmatpush3.bf16.msra.mxu0 %v926_v5  ;;  %825 = vmatpush3.bf16.msra.mxu1 %v926_v5  ;;  %v445_v29 = vmul.f32 0.015625, %v444_v28 }
  0x1d   : > { %793 = vmatprep.subr.bf16.mxu0 %v927_v6  ;;  %818 = vmatprep.subr.bf16.mxu1 %v927_v6  ;;  %v446_v30 = vmul.f32 %v443_v27, %v443_v27  ;;  %v455_v40 = vrot.slane %v443_v27, %v454_v36 }
  0x1f   : > { %v447_v31 = vsub.f32 %v445_v29, %v446_v30  ;;  %v473_v53 = vstv %s469_s7 }
  0x20   : > { %794 = vmatpush3.bf16.msra.mxu0 %v928_v7  ;;  %826 = vmatpush3.bf16.msra.mxu1 %v928_v7 }
  0x21   : > { %795 = vmatprep.subr.bf16.mxu0 %v929_v8  ;;  %819 = vmatprep.subr.bf16.mxu1 %v929_v8  ;;  %v448_v32 = vmax.f32 %v447_v31, 0.0 }
  0x23   : > { %v449_v33 = vadd.f32 1e-05, %v448_v32 }
  0x24   : > { %796 = vmatpush3.bf16.msra.mxu0 %v930_v9  ;;  %827 = vmatpush3.bf16.msra.mxu1 %v930_v9 }
  0x25   : > { %797 = vmatprep.subr.bf16.mxu0 %v931_v10  ;;  %820 = vmatprep.subr.bf16.mxu1 %v931_v10  ;;  %937 = vrsqrt.f32 %v449_v33 }
  0x28   : > { %798 = vmatpush3.bf16.msra.mxu0 %v932_v16  ;;  %828 = vmatpush3.bf16.msra.mxu1 %v932_v16 }
  0x29   : > { %799 = vmatprep.subr.bf16.mxu0 %v933_v17  ;;  %821 = vmatprep.subr.bf16.mxu1 %v933_v17 }
  0x2c   : > { %800 = vmatpush3.bf16.msra.mxu0 %v934_v18  ;;  %829 = vmatpush3.bf16.msra.mxu1 %v934_v18 }
  0x2d   : > { %801 = vmatprep.subr.bf16.mxu0 %v935_v19  ;;  %822 = vmatprep.subr.bf16.mxu1 %v935_v19 }
  0x30   : > { %802 = vmatpush3.bf16.msra.mxu0 %v936_v20  ;;  %830 = vmatpush3.bf16.msra.mxu1 %v936_v20 }
  0x32   : > { %v938_v37 = vpop.eup %937 }
  0x33   : > { %427 = vmatmul.mubr.bf16.vlgmr.msra.gmra.mxu0 %v262_v24  ;;  %435 = vmatmul.mubr.bf16.vlgmr.msra.gmra.mxu1 %v264_v25  ;;  %v464_v44 = vrot.slane %v938_v37, %v454_v36 }
  0xf3   : > { %v803_v38 = vpop.f32.mrf.mxu0  ;;  %v809_v39 = vpop.f32.mrf.mxu1 }
  0xf5   : > { %v804_v41 = vpop.f32.mrf.mxu0  ;;  %v810_v42 = vpop.f32.mrf.mxu1 }
  0xf6   : > { %v805_v43 = vadd.f32 %v804_v41, %v803_v38  ;;  %v811_v45 = vadd.f32 %v810_v42, %v809_v39 }
  0xf7   : > { %v806_v46 = vpop.f32.mrf.mxu0  ;;  %v812_v47 = vpop.f32.mrf.mxu1 }
  0xf8   : > { %v457_v49 = vsub.f32 %v805_v43, %v455_v40  ;;  %v459_v50 = vsub.f32 %v811_v45, %v455_v40 }
  0xf9   : > { %v807_v51 = vpop.f32.mrf.mxu0  ;;  %v813_v52 = vpop.f32.mrf.mxu1 }
  0xfa   : > { %v466_v54 = vmul.f32 %v464_v44, %v457_v49  ;;  %v468_v55 = vmul.f32 %v464_v44, %v459_v50  ;;  %v808_v56 = vadd.f32 %v807_v51, %v806_v46 }
  0xfc   : > { %v458_v57 = vsub.f32 %v808_v56, %v455_v40  ;;  %vm472_vm1 = vcmp.ge.f32.partialorder %v468_v55, 0.0  ;;  %v476_v58 = vmul.f32 %v473_v53, %v468_v55  ;;  %vm470_vm2 = vcmp.ge.f32.partialorder %v466_v54, 0.0 }
  0xfd   : > { %v474_v59 = vmul.f32 %v473_v53, %v466_v54 }
  0xfe   : > { %v467_v60 = vmul.f32 %v464_v44, %v458_v57  ;;  %v479_v61 = vsel %vm472_vm1, %v468_v55, %v476_v58 }
  0xff   : > { %v485_v62 = vsel %vm482_vm0, %v479_v61, -1e+30  ;;  %v477_v63 = vsel %vm470_vm2, %v466_v54, %v474_v59 }
 0x100   : > { %490 = vmax.xlane.f32.xlu1 %v485_v62  ;;  %v483_v0 = vsel %vm482_vm0, %v477_v63, -1e+30  ;;  %vm471_vm3 = vcmp.ge.f32.partialorder %v467_v60, 0.0  ;;  %v475_v1 = vmul.f32 %v473_v53, %v467_v60 }
 0x101   : > { %486 = vmax.xlane.f32.xlu0 %v483_v0 }
 0x102   : > { %v478_v2 = vsel %vm471_vm3, %v467_v60, %v475_v1 }
 0x103   : > { %v484_v3 = vsel %vm482_vm0, %v478_v2, -1e+30 }
 0x105   : > { %488 = vmax.xlane.f32.xlu0 %v484_v3 }
 0x189   : > { %v491_v4 = vpop.xlane.xlu1 %490 }
 0x18a   : > { %v494_v5 = vsub.f32 %v485_v62, %v491_v4  ;;  %v487_v6 = vpop.xlane.xlu0 %486 }
 0x18b   : > { %v492_v7 = vsub.f32 %v483_v0, %v487_v6 }
 0x18c   : > { %v499_v9 = vmul.f32 1.442695, %v494_v5 }
 0x18d   : > { %v495_v8 = vmul.f32 1.442695, %v492_v7 }
 0x18e   : > { %v489_v10 = vpop.xlane.xlu0 %488 }
 0x18f   : > { %939 = vpow2.f32 %v495_v8  ;;  %v493_v11 = vsub.f32 %v484_v3, %v489_v10 }
 0x190   : > { %941 = vpow2.f32 %v499_v9 }
 0x191   : > { %v497_v12 = vmul.f32 1.442695, %v493_v11 }
 0x193   : > { %943 = vpow2.f32 %v497_v12 }
 0x19c   : > { %v940_v13 = vpop.eup %939 }
 0x19d   : > { %501 = vadd.xlane.f32.xlu1 %v940_v13  ;;  %v942_v14 = vpop.eup %941 }
 0x1a0   : > { %v944_v15 = vpop.eup %943 }
 0x1a1   : > { %505 = vadd.xlane.f32.xlu1 %v942_v14  ;;  %503 = vadd.xlane.f32.xlu0 %v944_v15 }
 0x226   : > { %v502_v16 = vpop.xlane.xlu1 %501 }
 0x227   : > { %945 = vrcp.f32 %v502_v16 }
 0x22a   : > { %v506_v17 = vpop.xlane.xlu1 %505  ;;  %v504_v18 = vpop.xlane.xlu0 %503 }
 0x22b   : > { %947 = vrcp.f32 %v506_v17 }
 0x22c   : > { %949 = vrcp.f32 %v504_v18 }
 0x234   : > { %v946_v19 = vpop.eup %945 }
 0x235   : > { %v510_v20 = vmul.f32 %v946_v19, %v502_v16 }
 0x237   : > { %v513_v21 = vsub.f32 2.0, %v510_v20 }
 0x238   : > { %v948_v22 = vpop.eup %947 }
 0x239   : > { %v950_v23 = vpop.eup %949  ;;  %v516_v24 = vmul.f32 %v946_v19, %v513_v21  ;;  %v512_v25 = vmul.f32 %v948_v22, %v506_v17 }
 0x23a   : > { %v511_v26 = vmul.f32 %v950_v23, %v504_v18 }
 0x23b   : > { %v519_v27 = vmul.f32 %v940_v13, %v516_v24  ;;  %v515_v28 = vsub.f32 2.0, %v512_v25 }
 0x23c   : > { %v514_v29 = vsub.f32 2.0, %v511_v26 }
 0x23d   : > { %522 = vst [vmem:[%s1179_s10] sm:$0xff] %v519_v27  ;;  %v518_v30 = vmul.f32 %v948_v22, %v515_v28 }
 0x23e   : > { %v517_v31 = vmul.f32 %v950_v23, %v514_v29  ;;  %531 = sbr.rel (!%p1101_p4) target bundleno = 632 (0x278), region = 44 }
 0x23f   : > { %v521_v32 = vmul.f32 %v942_v14, %v518_v30 }
 0x240   : > { %v520_v33 = vmul.f32 %v944_v15, %v517_v31 }
 0x241   : > { %524 = vst [vmem:[%s1179_s10 + $0x10] sm:$0xff] %v521_v32 }
 0x242   : > { %523 = vst [vmem:[%s1179_s10 + $0x8] sm:$0xff] %v520_v33 }
 0x243   : > { %s1231_s20 = smov (!%p534_p8, %s533_s20), 3 }
 0x244   : > { %s773_s15 = sshll.u32 %s1231_s20, 7 }
 0x245   : > { %p776_p9 = scmp.eq.s32.totalorder %s773_s15, 0 }
 0x246   : > { %951 = sdivrem.u32 (!%p776_p9), %s1231_s20, 3 }
 0x247   : > { %542 = sbr.rel (%p776_p9) target bundleno = 632 (0x278), region = 48 }
 0x24f   : > { %s1197_s27 = spop.drf %951 }
 0x250   : > { %p777_p10 = scmp.le.s32.totalorder %s1197_s27, 0 }
 0x251   : > { %s1011_s3 = smov (!%p777_p10), %s1191_s14   ;;  %s1015_s30 = smov (!%p777_p10), %s1179_s10  }
 0x252   : > { %707 = sbr.rel (%p777_p10) target bundleno = 607 (0x25f), region = 124  ;;  %s1019_s16 = smov (!%p777_p10), 0  }
 0x253   : > { %s1023_s17 = smov (!%p777_p10), 0  }
 0x257 LB: >> { %v611_v34 = vld [vmem:[%s1017_s30] sm:$0xff]  ;;  %v613_v35 = vld [vmem:[%s1017_s30 + $0x8] sm:$0xff]  ;;  %v615_v36 = vld [vmem:[%s1017_s30 + $0x10] sm:$0xff]  ;;  %s617_s18 = sadd.s32 1, %s1021_s16  ;;  %s605_s17 = sadd.s32 1, %s1025_s17   ;;  %s1025_s17 = sphi %s1023_s17, %s605_s17   ;;  %s1021_s16 = sphi %s1019_s16, %s1020_s16   ;;  %s1017_s30 = sphi %s1015_s30, %s622_s30   ;;  %s1013_s3 = sphi %s1011_s3, %s623_s3  }
 0x258   : >> { %612 = vst [vmem:[%s1013_s3] sm:$0xff] %v611_v34  ;;  %614 = vst [vmem:[%s1013_s3 + $0x8] sm:$0xff] %v613_v35  ;;  %p618_p11 = scmp.ge.s32.totalorder %s617_s18, %s1197_s27  ;;  %p604_p12 = scmp.ge.s32.totalorder %s605_s17, %s1197_s27 }
 0x259   : >> { %616 = vst [vmem:[%s1013_s3 + $0x10] sm:$0xff] %v615_v36 }
 0x25a   : >> { %s1233_s18 = smov (%p618_p11, %s617_s18), 0  ;;  %607 = sbr.rel (!%p604_p12) target bundleno = 599 (0x257), region = 130 }
 0x25b   : >> { %s620_s19 = smul.u32 24, %s1233_s18  ;;  %s1020_s16 = smov %s1233_s18  }
 0x25d   : >> { %s622_s30 = scalar_lea.vmem %s1179_s10, %s620_s19 [#allocation3]   ;;  %s623_s3 = scalar_lea.vmem %s1191_s14, %s620_s19  }
 0x25f PF: > { %953 = sdivrem.u32 %s1231_s20, 3 }
 0x260   : > { %s778_s22 = smul.u32 24, %s1197_s27 }
 0x262   : > { %s628_s24 = scalar_lea.vmem %s1179_s10, %s778_s22 [#allocation3]   ;;  %s630_s25 = scalar_lea.vmem %s1191_s14, %s778_s22  }
 0x268   : > { %s954_s28 = spop.drf %953 }
 0x269   : > { %p780_p13 = scmp.le.s32.totalorder %s954_s28, 0 }
 0x26a   : > { %s1027_s29 = smov (!%p780_p13), %s630_s25   ;;  %s1031_s6 = smov (!%p780_p13), %s628_s24  }
 0x26b   : > { %721 = sbr.rel (%p780_p13) target bundleno = 632 (0x278), region = 135  ;;  %s1035_s7 = smov (!%p780_p13), 0  }
 0x26c   : > { %s1039_s8 = smov (!%p780_p13), 0  }
 0x270 LB: >> { %v640_v37 = vld [vmem:[%s1033_s6] sm:$0xff]  ;;  %s642_s9 = sadd.s32 1, %s1037_s7  ;;  %s634_s8 = sadd.s32 1, %s1041_s8   ;;  %s1041_s8 = sphi %s1039_s8, %s634_s8   ;;  %s1037_s7 = sphi %s1035_s7, %s1036_s7   ;;  %s1033_s6 = sphi %s1031_s6, %s647_s6   ;;  %s1029_s29 = sphi %s1027_s29, %s648_s29  }
 0x271   : >> { %641 = vst [vmem:[%s1029_s29] sm:$0xff] %v640_v37  ;;  %p643_p0 = scmp.ge.s32.totalorder %s642_s9, %s954_s28  ;;  %p633_p1 = scmp.ge.s32.totalorder %s634_s8, %s954_s28 }
 0x273   : >> { %s1235_s9 = smov (%p643_p0, %s642_s9), 0  ;;  %636 = sbr.rel (!%p633_p1) target bundleno = 624 (0x270), region = 141 }
 0x274   : >> { %s781_s10 = sshll.u32 %s1235_s9, 3  ;;  %s1036_s7 = smov %s1235_s9  }
 0x275   : >> { %s647_s6 = scalar_lea.vmem %s628_s24, %s781_s10 [#allocation3]   ;;  %s648_s29 = scalar_lea.vmem %s630_s25, %s781_s10  }
 0x278 PF: > { %p13_p2 = scmp.ge.s32.totalorder %s1091_s23, 5   ;;  %s1227_s20 = smov %s1005_s21 }
 0x279   : > { %s1228_s21 = smov %s1099_s26  ;;  %s1229_s22 = smov %s1091_s23 }
 0x27a   :  { %15 = sbr.rel (!%p13_p2) target bundleno = 4 (0x4), region = 152 }

// kernel: gdn_forward.2
= control target key start
LH: loop header
LB: loop body
LE: loop exit
PB: predicated region body
PF: predicated region fallthrough
CT: control target
= control target key end

     0   :  { %s1810_s0 = inlined_call_operand.vmem [shape: bf16[64,64], index: 0, kind: input, shape index: {}]   ;;  %s1811_s1 = inlined_call_operand.vmem [shape: bf16[64,256], index: 1, kind: input, shape index: {}]   ;;  %s1812_s2 = inlined_call_operand.<no memory space> [shape: f32[1], index: 2, kind: input, shape index: {}]   ;;  %s1813_s3 = inlined_call_operand.hbm [shape: bf16[256,128], index: 3, kind: input, shape index: {}]   ;;  %s1814_s4 = inlined_call_operand.vmem [shape: f32[64,256], index: 4, kind: output, shape index: {0}]   ;;  %s1815_s5 = inlined_call_operand.vmem [shape: f32[1,128], index: 5, kind: output, shape index: {1}]   ;;  %s1816_s6 = inlined_call_operand.vmem [shape: f32[1,128], index: 6, kind: output, shape index: {2}]  }
   0x1   :  { %12 = sst [smem:[#allocation4]] %s1812_s2 }
   0x2   :  { %13 = vsyncpa [#allocation6], 0  ;;  %s1517_s23 = smov 0   ;;  %s1519_s24 = smov 0  }
   0x3   :  { %s1521_s25 = smov 0   ;;  %s1523_s26 = smov 0  }
   0x4   :  { %s1525_s27 = smov 0   ;;  %s1527_s28 = smov 0  }
   0x5   :  { %s1529_s29 = smov 0  }
   0x6 LB: > { %s1039_s2 = sadd.s32 4294967295, %s1438_s29   ;;  %s28_s30 = sadd.s32 1, %s1430_s27  ;;  %s1438_s29 = sphi %s1529_s29, %s19_s29   ;;  %s1434_s28 = sphi %s1527_s28, %s1829_s28   ;;  %s1430_s27 = sphi %s1525_s27, %s1828_s27   ;;  %s1426_s26 = sphi %s1523_s26, %s1827_s26   ;;  %s1422_s25 = sphi %s1521_s25, %s1826_s25   ;;  %s1418_s24 = sphi %s1519_s24, %s1825_s24   ;;  %s1414_s23 = sphi %s1517_s23, %s1824_s23  }
   0x7   : > { %p29_p0 = scmp.ge.s32.totalorder %s28_s30, 3  ;;  %s31_s7 = sadd.s32 1, %s1434_s28 }
   0x8   : > { %s124_s8 = smul.u32 %s1430_s27, %s1434_s28  ;;  %s129_s9 = sadd.s32 1, %s1418_s24 }
   0x9   : > { %s1831_s30 = smov (%p29_p0, %s28_s30), 0  ;;  %s1833_s7 = smov (!%p29_p0, %s31_s7), %s1434_s28 }
   0xa   : > { %p139_p1 = scmp.ne.s32.totalorder %s1418_s24, %s1414_s23  ;;  %p140_p2 = scmp.eq.s32.totalorder %s1039_s2, 5 }
   0xb   : > { %p33_p3 = scmp.ge.s32.totalorder %s1833_s7, 2  ;;  %p1041_p4 = scmp.ge.s32.totalorder %s1438_s29, 1 }
   0xc   : > { %p1564_p5 = por %p140_p2, %p139_p1  ;;  %p195_p6 = scmp.lt.s32.totalorder %s1438_s29, 7 }
   0xd   : > { %s1835_s7 = smov (%p33_p3, %s1833_s7), 0  ;;  %p1577_p8 = scmp.eq.s32.totalorder %s1039_s2, 0 }
   0xe   : > { %p1571_p7 = pnand %p1041_p4, %p195_p6  ;;  %s125_s12 = smul.u32 %s1835_s7, %s1831_s30 }
   0xf   : > { %s1472_s15 = smov [#allocation5]  }
  0x10   : > { %p1152_p9 = pneg %p1571_p7  ;;  %s126_s14 = ssub.s32 %s124_s8, %s125_s12 }
  0x11   : > { %s213_s16 = sshll.u32 %s1472_s15, 4  ;;  %p127_p10 = scmp.eq.s32.totalorder %s126_s14, 0  ;;  %s214_s16 = int_to_ptr.vmem [resolvable:$true] %s213_s16 }
  0x12   : > { %p1585_p11 = pnand %p1577_p8, %p1152_p9  ;;  %s1333_s19 = scalar_lea.vmem %s214_s16, 2048 }
  0x13   : > { %s1590_s18 = scalar_select %p127_p10, %s1418_s24, %s129_s9  }
  0x14   : > { %p1324_p12 = pneg %p1585_p11  ;;  %p1334_p13 = scmp.ne.s32.totalorder %s214_s16, %s1333_s19 }
  0x15   : > { %p1341_p2 = scmp.lt.s32.totalorder %s214_s16, %s214_s16  ;;  %p1342_p3 = scmp.lt.s32.totalorder %s1333_s19, %s1333_s19 }
  0x16   : > { %p1336_p0 = pnand %p1334_p13, %p1324_p12 }
  0x17   : > { %p1343_p4 = por %p1342_p3, %p1341_p2 }
  0x18   : > { %p1337_p1 = pneg %p1336_p0 }
  0x1a   : > { %p1344_p6 = pnand %p1343_p4, %p1337_p1 }
  0x1c   : > { %1347 = shalt.err (!%p1344_p6)
}
  0x1d   : > { %s1473_s20 = smov 64   ;;  %s1474_s21 = smov 4  }
  0x1e   : > { %1155 = dma.hbm_to_vmem [thread:$0]  (!%p1585_p11), %s1813_s3, 2048, %s214_s16, [#allocation6], %s1473_s20, %s1473_s20, %s1474_s21  }
  0x1f   : > { %246 = sbr.rel (%p1571_p7) target bundleno = 640 (0x280), region = 36 }
  0x24   : > { %1409 = dma.done.wait (%p1577_p8), [#allocation6], 2048  }
  0x25   : > { %1411 = vsyncadd (%p1577_p8), [#allocation6], 4294965248  ;;  %s272_s8 = sand.u32 1, %s1414_s23   ;;  %s279_s9 = smul.u32 3, %s1422_s25 }
  0x26   : > { %s1147_s12 = smul.u32 48, %s272_s8  ;;  %p301_p9 = scmp.eq.s32.totalorder %s1426_s26, 0 }
  0x27   : > { %p284_p10 = scmp.lt.s32.totalorder %s279_s9, 7  ;;  %p302_p11 = scmp.eq.s32.totalorder %s1422_s25, 0 }
  0x28   : > { %s1616_s16 = scalar_lea.vmem [#allocation7], %s1147_s12  }
  0x29   : > { %s1837_s9 = smov (!%p284_p10, %s279_s9), 7  ;;  %p303_p7 = pnand %p302_p11, %p301_p9 }
  0x2a   : > { %s1046_s11 = sshll.u32 %s1837_s9, 2 }
  0x2b   : > { %s1614_s13 = scalar_lea.vmem %s1810_s0, %s1046_s11  ;;  %306 = sbr.rel (%p303_p7) target bundleno = 52 (0x34), region = 44 }
  0x30   : > { %v307_v0 = vlaneseq  ;;  %v1475_v1 = vmov 0.0  }
  0x32   : > { %vm309_vm0 = vcmp.lt.s32.totalorder %v307_v0, 256 }
  0x33   : > { %311 = vst.msk [vmem:[#allocation2] sm:$0x3] %vm309_vm0, %v1475_v1  ;;  %312 = vst.msk [vmem:[#allocation3] sm:$0x3] %vm309_vm0, %v1475_v1 }
  0x34 PF: > { %p313_p8 = scmp.eq.s32.totalorder %s1426_s26, 1 }
  0x36   : > { %p314_p12 = pnand %p313_p8, %p302_p11 }
  0x38   : > { %317 = sbr.rel (%p314_p12) target bundleno = 63 (0x3f), region = 48 }
  0x3d   : > { %v1476_v2 = vmov 0.0  }
  0x3e   : > { %318 = vst [vmem:[%s1815_s5] sm:$0x1] %v1476_v2  ;;  %319 = vst [vmem:[%s1816_s6] sm:$0x1] %v1476_v2 }
  0x3f PF: > { %v1286_v3 = vld [vmem:[%s1811_s1 + $0x34] ss:$8 sps:$4 sm:$0xff]   ;;  %v1288_v4 = vld [vmem:[%s1811_s1 + $0x30] ss:$8 sps:$4 sm:$0xff]   ;;  %v1477_v5 = vmov 0   ;;  %v1298_v12 = vld [vmem:[%s1614_s13] sm:$0xff]   ;;  %v437_v14 = vlaneseq }
  0x40   : > { %418 = vmatprep.mubr.bf16.mxu0 %v1477_v5  ;;  %428 = vmatprep.mubr.bf16.mxu1 %v1477_v5  ;;  %v1289_v6 = vld [vmem:[%s1811_s1 + $0x24] ss:$8 sps:$4 sm:$0xff]   ;;  %v1291_v7 = vld [vmem:[%s1811_s1 + $0x20] ss:$8 sps:$4 sm:$0xff]   ;;  %v1292_v8 = vld [vmem:[%s1811_s1 + $0x14] ss:$8 sps:$4 sm:$0xff]  }
  0x41   : > { %394 = vmatprep.subr.bf16.mxu0 %v1286_v3  ;;  %1123 = vmatprep.subr.bf16.mxu1 %v1286_v3  ;;  %v1294_v9 = vld [vmem:[%s1811_s1 + $0x10] ss:$8 sps:$4 sm:$0xff]   ;;  %v1295_v10 = vld [vmem:[%s1811_s1 + $0x4] ss:$8 sps:$4 sm:$0xff]   ;;  %v1297_v11 = vld [vmem:[%s1811_s1] ss:$8 sps:$4 sm:$0xff]  }
  0x42   : > { %395 = vmatpush1.bf16.msra.mxu0 %v1288_v4  ;;  %1127 = vmatpush1.bf16.msra.mxu1 %v1288_v4  ;;  %v1299_v13 = vld [vmem:[%s1614_s13 + $0x8] ss:$0 sps:$4 sm:$0xff]   ;;  %vm379_vm1 = vcmask 523264   ;;  %v1654_v15 = vshrl.u32 %v437_v14, 7  ;;  %s441_s8 = smul.u32 24, %s1422_s25  ;;  %p1059_p13 = scmp.ne.s32.totalorder %s1426_s26, 0 }
  0x43   : > { %396 = vmatprep.subr.bf16.mxu0 %v1289_v6  ;;  %1124 = vmatprep.subr.bf16.mxu1 %v1289_v6 }
  0x44   : > { %v439_v16 = vadd.s32 8, %v1654_v15  ;;  %v440_v17 = vadd.s32 16, %v1654_v15  ;;  %v442_v18 = vstv %s441_s8 }
  0x45   : > { %v1660_v19 = vadd.s32 %v442_v18, %v1654_v15 }
  0x46   : > { %397 = vmatpush1.bf16.msra.mxu0 %v1291_v7  ;;  %1128 = vmatpush1.bf16.msra.mxu1 %v1291_v7  ;;  %v1662_v20 = vadd.s32 %v442_v18, %v439_v16  ;;  %v1664_v21 = vadd.s32 %v442_v18, %v440_v17 }
  0x47   : > { %398 = vmatprep.subr.bf16.mxu0 %v1292_v8  ;;  %1125 = vmatprep.subr.bf16.mxu1 %v1292_v8  ;;  %vm446_vm2 = vcmp.lt.s32.totalorder %v1660_v19, 64 }
  0x48   : > { %vm447_vm3 = vcmp.lt.s32.totalorder %v1662_v20, 64  ;;  %vm448_vm4 = vcmp.lt.s32.totalorder %v1664_v21, 64 }
  0x4a   : > { %399 = vmatpush1.bf16.msra.mxu0 %v1294_v9  ;;  %1129 = vmatpush1.bf16.msra.mxu1 %v1294_v9 }
  0x4b   : > { %400 = vmatprep.subr.bf16.mxu0 %v1295_v10  ;;  %1126 = vmatprep.subr.bf16.mxu1 %v1295_v10 }
  0x4e   : > { %401 = vmatpush1.bf16.msra.mxu0 %v1297_v11  ;;  %1130 = vmatpush1.bf16.msra.mxu1 %v1297_v11 }
  0x51   : > { %1057 = vmatmul.mubr.msk.bf16.vlgmr.msra.gmra.mxu0 %vm379_vm1, %v1298_v12  ;;  %1058 = vmatmul.mubr.msk.bf16.vlgmr.msra.gmra.mxu1 %vm379_vm1, %v1299_v13 }
 0x111   : > { %v1669_v22 = vpop.f32.mrf.mxu0  ;;  %v1671_v23 = vpop.f32.mrf.mxu1 }
 0x113   : > { %v1673_v24 = vpop.f32.mrf.mxu0  ;;  %v1675_v25 = vpop.f32.mrf.mxu1  ;;  %451 = sbr.rel (%p1059_p13) target bundleno = 309 (0x135), region = 52 }
 0x115   : > { %v1677_v26 = vpop.f32.mrf.mxu0  ;;  %v434_v27 = vpop.f32.mrf.mxu1 }
 0x117   : > { %v1679_v28 = vpop.f32.mrf.mxu0  ;;  %v435_v29 = vpop.f32.mrf.mxu1 }
 0x118   : > { %v458_v30 = vsel %vm446_vm2, %v1669_v22, 0.0  ;;  %v459_v31 = vsel %vm446_vm2, %v1673_v24, 0.0  ;;  %v460_v32 = vsel %vm447_vm3, %v1677_v26, 0.0  ;;  %v461_v33 = vsel %vm447_vm3, %v1679_v28, 0.0  ;;  %v464_v17 = vld [vmem:[#allocation2] sm:$0x3] }
 0x119   : > { %v462_v34 = vsel %vm448_vm4, %v1671_v23, 0.0  ;;  %v463_v35 = vsel %vm448_vm4, %v1675_v25, 0.0  ;;  %v465_v36 = vadd.f32 %v460_v32, %v458_v30  ;;  %v473_v37 = vadd.f32 %v461_v33, %v459_v31 }
 0x11a   : > { %v506_v38 = vmul.f32 %v458_v30, %v458_v30  ;;  %v507_v39 = vmul.f32 %v459_v31, %v459_v31  ;;  %v508_v42 = vmul.f32 %v460_v32, %v460_v32  ;;  %v509_v43 = vmul.f32 %v461_v33, %v461_v33  ;;  %v505_v32 = vld [vmem:[#allocation3] sm:$0x3] }
 0x11b   : > { %v466_v40 = vadd.f32 %v465_v36, %v462_v34  ;;  %v474_v41 = vadd.f32 %v473_v37, %v463_v35  ;;  %v510_v44 = vmul.f32 %v462_v34, %v462_v34  ;;  %v511_v45 = vmul.f32 %v463_v35, %v463_v35 }
 0x11c   : > { %v512_v48 = vadd.f32 %v508_v42, %v506_v38  ;;  %v520_v49 = vadd.f32 %v509_v43, %v507_v39  ;;  %v1478_v52 = vmov 1966171168   ;;  %vm502_vm5 = vcmp.lt.s32.totalorder %v437_v14, 256 }
 0x11d   : > { %v467_v46 = vrot.slane %v466_v40, 4  ;;  %v475_v47 = vrot.slane %v474_v41, 4  ;;  %v485_v53 = vunpack.c.l.s4 %v1478_v52 }
 0x11e   : > { %v513_v54 = vadd.f32 %v512_v48, %v510_v44  ;;  %v521_v55 = vadd.f32 %v520_v49, %v511_v45 }
 0x11f   : > { %v468_v50 = vadd.f32 %v467_v46, %v466_v40  ;;  %v476_v51 = vadd.f32 %v475_v47, %v474_v41  ;;  %v486_v62 = vunpack.c.0.s8 %v485_v53 }
 0x120   : > { %v514_v58 = vrot.slane %v513_v54, 4  ;;  %v522_v59 = vrot.slane %v521_v55, 4 }
 0x121   : > { %v469_v56 = vrot.slane %v468_v50, 2  ;;  %v477_v57 = vrot.slane %v476_v51, 2  ;;  %v489_v7 = vsub.s32 %v486_v62, %v1654_v15 }
 0x122   : > { %v515_v63 = vadd.f32 %v514_v58, %v513_v54  ;;  %v523_v0 = vadd.f32 %v522_v59, %v521_v55 }
 0x123   : > { %v470_v60 = vadd.f32 %v469_v56, %v468_v50  ;;  %v478_v61 = vadd.f32 %v477_v57, %v476_v51 }
 0x124   : > { %v516_v3 = vrot.slane %v515_v63, 2  ;;  %v524_v4 = vrot.slane %v523_v0, 2 }
 0x125   : > { %v471_v1 = vrot.slane %v470_v60, 1  ;;  %v479_v2 = vrot.slane %v478_v61, 1 }
 0x126   : > { %v517_v8 = vadd.f32 %v516_v3, %v515_v63  ;;  %v525_v9 = vadd.f32 %v524_v4, %v523_v0 }
 0x127   : > { %v472_v5 = vadd.f32 %v471_v1, %v470_v60  ;;  %v480_v6 = vadd.f32 %v479_v2, %v478_v61 }
 0x128   : > { %v518_v11 = vrot.slane %v517_v8, 1  ;;  %v526_v12 = vrot.slane %v525_v9, 1 }
 0x129   : > { %v483_v10 = vcombine.low %v472_v5, %v480_v6 }
 0x12a   : > { %v519_v16 = vadd.f32 %v518_v11, %v517_v8  ;;  %v527_v18 = vadd.f32 %v526_v12, %v525_v9 }
 0x12b   : > { %v490_v13 = vrot.slane %v483_v10, %v489_v7 }
 0x12c   : > { %v530_v29 = vcombine.low %v519_v16, %v527_v18 }
 0x12d   : > { %v497_v27 = vrot.slane %v490_v13, %v489_v7 }
 0x12e   : > { %v537_v31 = vrot.slane %v530_v29, %v489_v7 }
 0x12f   : > { %v499_v30 = vadd.f32 %v497_v27, %v464_v17 }
 0x130   : > { %v544_v33 = vrot.slane %v537_v31, %v489_v7 }
 0x131   : > { %504 = vst.msk [vmem:[#allocation2] sm:$0x3] %vm502_vm5, %v499_v30 }
 0x132   : > { %v546_v34 = vadd.f32 %v544_v33, %v505_v32 }
 0x134   : > { %547 = vst.msk [vmem:[#allocation3] sm:$0x3] %vm502_vm5, %v546_v34 }
 0x135 PF: > { %p1060_p0 = scmp.ne.s32.totalorder %s1426_s26, 1 }
 0x136   : > { %s594_s13 = sld [smem:[#allocation4]] (!%p1060_p0) }
 0x137   : > { %550 = sbr.rel (%p1060_p0) target bundleno = 579 (0x243), region = 56 }
 0x13c   : > { %v1300_v35 = vld [vmem:[#allocation5 + $0x78] sm:$0xff]   ;;  %v1302_v37 = vld [vmem:[#allocation5 + $0x70] sm:$0xff]   ;;  %v1304_v38 = vld [vmem:[#allocation5 + $0x68] sm:$0xff]   ;;  %v567_v58 = vsub.s32 1, %v1654_v15  ;;  %v563_v59 = vsub.s32 0, %v1654_v15  ;;  %v601_v7 = vstv %s594_s13 }
 0x13d   : > { %v1301_v36 = vld [vmem:[#allocation5 + $0x38] sm:$0xff]   ;;  %1095 = vmatprep.subr.bf16.mxu0 %v1300_v35  ;;  %1131 = vmatprep.subr.bf16.mxu1 %v1300_v35  ;;  %v1303_v14 = vld [vmem:[#allocation5 + $0x30] sm:$0xff]   ;;  %v1305_v39 = vld [vmem:[#allocation5 + $0x28] sm:$0xff]  }
 0x13e   : > { %1096 = vmatpush3.bf16.msra.mxu0 %v1301_v36  ;;  %1139 = vmatpush3.bf16.msra.mxu1 %v1301_v36  ;;  %v1306_v40 = vld [vmem:[#allocation5 + $0x60] sm:$0xff]   ;;  %v1308_v42 = vld [vmem:[#allocation5 + $0x58] sm:$0xff]   ;;  %v1310_v44 = vld [vmem:[#allocation5 + $0x50] sm:$0xff]  }
 0x13f   : > { %1097 = vmatprep.subr.bf16.mxu0 %v1302_v37  ;;  %1132 = vmatprep.subr.bf16.mxu1 %v1302_v37  ;;  %v1307_v41 = vld [vmem:[#allocation5 + $0x20] sm:$0xff]   ;;  %v1309_v43 = vld [vmem:[#allocation5 + $0x18] sm:$0xff]   ;;  %v1311_v49 = vld [vmem:[#allocation5 + $0x10] sm:$0xff]  }
 0x140   : > { %v551_v45 = vld [vmem:[#allocation2] sm:$0x3]  ;;  %v553_v46 = vld [vmem:[#allocation3] sm:$0x3]  ;;  %v1312_v51 = vld [vmem:[#allocation5 + $0x48] sm:$0xff]  }
 0x141   : > { %v552_v47 = vmul.f32 0.015625, %v551_v45  ;;  %v554_v48 = vmul.f32 0.015625, %v553_v46  ;;  %v1313_v53 = vld [vmem:[#allocation5 + $0x8] sm:$0xff]   ;;  %v1314_v55 = vld [vmem:[#allocation5 + $0x40] sm:$0xff]   ;;  %v809_v20 = vld [vmem:[%s1815_s5] sm:$0x1] }
 0x142   : > { %1098 = vmatpush3.bf16.msra.mxu0 %v1303_v14  ;;  %1140 = vmatpush3.bf16.msra.mxu1 %v1303_v14  ;;  %v1315_v57 = vld [vmem:[#allocation5] sm:$0xff]  }
 0x143   : > { %1099 = vmatprep.subr.bf16.mxu0 %v1304_v38  ;;  %1133 = vmatprep.subr.bf16.mxu1 %v1304_v38  ;;  %v555_v50 = vmul.f32 %v552_v47, %v552_v47  ;;  %v568_v60 = vrot.slane %v552_v47, %v567_v58  ;;  %v564_v61 = vrot.slane %v552_v47, %v563_v59 }
 0x145   : > { %v556_v52 = vsub.f32 %v554_v48, %v555_v50  ;;  %v572_v62 = vsub.f32 %v1673_v24, %v568_v60  ;;  %v574_v63 = vsub.f32 %v1679_v28, %v568_v60  ;;  %v576_v0 = vsub.f32 %v1675_v25, %v568_v60 }
 0x146   : > { %1100 = vmatpush3.bf16.msra.mxu0 %v1305_v39  ;;  %1141 = vmatpush3.bf16.msra.mxu1 %v1305_v39  ;;  %v571_v1 = vsub.f32 %v1669_v22, %v564_v61  ;;  %v573_v3 = vsub.f32 %v1677_v26, %v564_v61  ;;  %v575_v4 = vsub.f32 %v1671_v23, %v564_v61 }
 0x147   : > { %1101 = vmatprep.subr.bf16.mxu0 %v1306_v40  ;;  %1134 = vmatprep.subr.bf16.mxu1 %v1306_v40  ;;  %v557_v54 = vmax.f32 %v556_v52, 0.0 }
 0x149   : > { %v558_v56 = vadd.f32 1e-05, %v557_v54 }
 0x14a   : > { %1102 = vmatpush3.bf16.msra.mxu0 %v1307_v41  ;;  %1142 = vmatpush3.bf16.msra.mxu1 %v1307_v41 }
 0x14b   : > { %1103 = vmatprep.subr.bf16.mxu0 %v1308_v42  ;;  %1135 = vmatprep.subr.bf16.mxu1 %v1308_v42  ;;  %1316 = vrsqrt.f32 %v558_v56 }
 0x14e   : > { %1104 = vmatpush3.bf16.msra.mxu0 %v1309_v43  ;;  %1143 = vmatpush3.bf16.msra.mxu1 %v1309_v43 }
 0x14f   : > { %1105 = vmatprep.subr.bf16.mxu0 %v1310_v44  ;;  %1136 = vmatprep.subr.bf16.mxu1 %v1310_v44 }
 0x152   : > { %1106 = vmatpush3.bf16.msra.mxu0 %v1311_v49  ;;  %1144 = vmatpush3.bf16.msra.mxu1 %v1311_v49 }
 0x153   : > { %1107 = vmatprep.subr.bf16.mxu0 %v1312_v51  ;;  %1137 = vmatprep.subr.bf16.mxu1 %v1312_v51 }
 0x156   : > { %1108 = vmatpush3.bf16.msra.mxu0 %v1313_v53  ;;  %1145 = vmatpush3.bf16.msra.mxu1 %v1313_v53 }
 0x157   : > { %1109 = vmatprep.subr.bf16.mxu0 %v1314_v55  ;;  %1138 = vmatprep.subr.bf16.mxu1 %v1314_v55 }
 0x158   : > { %v1317_v2 = vpop.eup %1316 }
 0x159   : > { %v585_v5 = vrot.slane %v1317_v2, %v567_v58  ;;  %v581_v6 = vrot.slane %v1317_v2, %v563_v59 }
 0x15a   : > { %1110 = vmatpush3.bf16.msra.mxu0 %v1315_v57  ;;  %1146 = vmatpush3.bf16.msra.mxu1 %v1315_v57 }
 0x15b   : > { %v589_v15 = vmul.f32 %v585_v5, %v572_v62  ;;  %v591_v8 = vmul.f32 %v585_v5, %v574_v63  ;;  %v593_v9 = vmul.f32 %v585_v5, %v576_v0  ;;  %v588_v10 = vmul.f32 %v581_v6, %v571_v1  ;;  %v820_v63 = vld [vmem:[%s1816_s6] sm:$0x1] }
 0x15c   : > { %v590_v24 = vmul.f32 %v581_v6, %v573_v3  ;;  %v592_v28 = vmul.f32 %v581_v6, %v575_v4 }
 0x15d   : > { %vm596_vm6 = vcmp.ge.f32.partialorder %v589_v15, 0.0  ;;  %vm598_vm7 = vcmp.ge.f32.partialorder %v591_v8, 0.0  ;;  %v603_v25 = vmul.f32 %v601_v7, %v589_v15  ;;  %v605_v22 = vmul.f32 %v601_v7, %v591_v8 }
 0x15e   : > { %vm600_vm8 = vcmp.ge.f32.partialorder %v593_v9, 0.0  ;;  %v607_v26 = vmul.f32 %v601_v7, %v593_v9  ;;  %vm595_vm9 = vcmp.ge.f32.partialorder %v588_v10, 0.0  ;;  %vm597_vm10 = vcmp.ge.f32.partialorder %v590_v24, 0.0 }
 0x15f   : > { %v609_v23 = vsel %vm596_vm6, %v589_v15, %v603_v25  ;;  %v611_v11 = vsel %vm598_vm7, %v591_v8, %v605_v22  ;;  %v602_v12 = vmul.f32 %v601_v7, %v588_v10  ;;  %v604_v13 = vmul.f32 %v601_v7, %v590_v24 }
 0x160   : > { %615 = vst [vmem:[%s1616_s16 + $0x8] sm:$0xff] %v609_v23  ;;  %617 = vst [vmem:[%s1616_s16 + $0x18] sm:$0xff] %v611_v11  ;;  %v621_v16 = vpack.c.bf16 %v611_v11, %v609_v23  ;;  %v613_v17 = vsel %vm600_vm8, %v593_v9, %v607_v26  ;;  %vm599_vm11 = vcmp.ge.f32.partialorder %v592_v28, 0.0  ;;  %v606_v18 = vmul.f32 %v601_v7, %v592_v28 }
 0x161   : > { %619 = vst [vmem:[%s1616_s16 + $0x28] sm:$0xff] %v613_v17  ;;  %v623_v27 = vpack.c.bf16 %v613_v17, %v613_v17  ;;  %v608_v29 = vsel %vm595_vm9, %v588_v10, %v602_v12  ;;  %v610_v30 = vsel %vm597_vm10, %v590_v24, %v604_v13 }
 0x162   : > { %784 = vmatprep.mubr.bf16.mxu0 %v621_v16  ;;  %614 = vst [vmem:[%s1616_s16] sm:$0xff] %v608_v29  ;;  %616 = vst [vmem:[%s1616_s16 + $0x10] sm:$0xff] %v610_v30  ;;  %v620_v31 = vpack.c.bf16 %v610_v30, %v608_v29  ;;  %v612_v32 = vsel %vm599_vm11, %v592_v28, %v606_v18 }
 0x163   : > { %792 = vmatprep.mubr.bf16.mxu1 %v623_v27  ;;  %618 = vst [vmem:[%s1616_s16 + $0x20] sm:$0xff] %v612_v32  ;;  %v622_v33 = vpack.c.bf16 %v612_v32, %v612_v32 }
 0x164   : > { %785 = vmatmul.mubr.bf16.vlgmr.msra.gmra.mxu0 %v620_v31 }
 0x165   : > { %793 = vmatmul.mubr.bf16.vlgmr.msra.gmra.mxu1 %v622_v33 }
 0x224   : > { %v1111_v34 = vpop.f32.mrf.mxu0 }
 0x225   : > { %v1117_v35 = vpop.f32.mrf.mxu1 }
 0x226   : > { %v1112_v36 = vpop.f32.mrf.mxu0 }
 0x227   : > { %v1113_v37 = vadd.f32 %v1112_v36, %v1111_v34  ;;  %v1118_v14 = vpop.f32.mrf.mxu1 }
 0x228   : > { %v1114_v38 = vpop.f32.mrf.mxu0  ;;  %v1119_v39 = vadd.f32 %v1118_v14, %v1117_v35 }
 0x229   : > { %v1120_v40 = vpop.f32.mrf.mxu1  ;;  %v806_v42 = vsel %vm446_vm2, %v1113_v37, 0.0 }
 0x22a   : > { %v1115_v41 = vpop.f32.mrf.mxu0  ;;  %v808_v45 = vsel %vm448_vm4, %v1119_v39, 0.0  ;;  %v821_v47 = vmul.f32 %v806_v42, %v806_v42 }
 0x22b   : > { %v1116_v43 = vadd.f32 %v1115_v41, %v1114_v38  ;;  %v1121_v44 = vpop.f32.mrf.mxu1  ;;  %v823_v50 = vmul.f32 %v808_v45, %v808_v45 }
 0x22d   : > { %v807_v46 = vsel %vm447_vm3, %v1116_v43, 0.0 }
 0x22e   : > { %v810_v48 = vadd.f32 %v807_v46, %v806_v42  ;;  %v822_v49 = vmul.f32 %v807_v46, %v807_v46 }
 0x230   : > { %v811_v51 = vadd.f32 %v810_v48, %v808_v45  ;;  %v824_v52 = vadd.f32 %v822_v49, %v821_v47 }
 0x232   : > { %v812_v53 = vrot.slane %v811_v51, 4  ;;  %v825_v54 = vadd.f32 %v824_v52, %v823_v50 }
 0x234   : > { %v813_v55 = vadd.f32 %v812_v53, %v811_v51  ;;  %v826_v56 = vrot.slane %v825_v54, 4 }
 0x236   : > { %v814_v19 = vrot.slane %v813_v55, 2  ;;  %v827_v57 = vadd.f32 %v826_v56, %v825_v54 }
 0x238   : > { %v815_v58 = vadd.f32 %v814_v19, %v813_v55  ;;  %v828_v59 = vrot.slane %v827_v57, 2 }
 0x23a   : > { %v816_v60 = vrot.slane %v815_v58, 1  ;;  %v829_v21 = vadd.f32 %v828_v59, %v827_v57 }
 0x23c   : > { %v817_v61 = vadd.f32 %v816_v60, %v815_v58  ;;  %v830_v62 = vrot.slane %v829_v21, 1 }
 0x23e   : > { %v818_v0 = vadd.f32 %v817_v61, %v809_v20  ;;  %v831_v1 = vadd.f32 %v830_v62, %v829_v21 }
 0x240   : > { %819 = vst [vmem:[%s1815_s5] sm:$0x1] %v818_v0  ;;  %v832_v2 = vadd.f32 %v831_v1, %v820_v63 }
 0x242   : > { %833 = vst [vmem:[%s1816_s6] sm:$0x1] %v832_v2 }
 0x243 PF: > { %840 = sbr.rel (!%p1564_p5) target bundleno = 640 (0x280), region = 60 }
 0x244   : > { %s841_s20 = smul.u32 (%p1564_p5), %s1422_s25, %s1426_s26 }
 0x246   : > { %s842_s21 = smul.u32 (%p1564_p5), 3, %s841_s20 }
 0x247   : > { %s1094_s22 = smul.u32 (%p1564_p5), 48, %s841_s20 }
 0x248   : > { %s843_s2 = ssub.s32 8, %s842_s21 }
 0x249   : > { %p844_p1 = scmp.lt.s32.totalorder %s843_s2, 3  ;;  %s1742_s9 = scalar_lea.vmem %s1814_s4, %s1094_s22  }
 0x24b   : > { %s1839_s2 = smov (!%p844_p1, %s843_s2), 3 }
 0x24c   : > { %s1091_s12 = sshll.u32 %s1839_s2, 8 }
 0x24d   : > { %p1082_p2 = scmp.eq.s32.totalorder %s1091_s12, 0 }
 0x24e   : > { %1318 = sdivrem.u32 (!%p1082_p2), %s1839_s2, 3 }
 0x24f   : > { %854 = sbr.rel (%p1082_p2) target bundleno = 640 (0x280), region = 64 }
 0x257   : > { %s1748_s10 = spop.drf %1318 }
 0x258   : > { %p1083_p5 = scmp.le.s32.totalorder %s1748_s10, 0 }
 0x259   : > { %s1821_s25 = smov (!%p1083_p5), %s1742_s9  ;;  %s1822_s26 = smov (!%p1083_p5), %s1616_s16 }
 0x25a   : > { %975 = sbr.rel (%p1083_p5) target bundleno = 615 (0x267), region = 129  ;;  %s1757_s11 = smov (!%p1083_p5), 0  }
 0x25b   : > { %s1759_s14 = smov (!%p1083_p5), 0  }
 0x25f LB: >> { %v868_v3 = vld [vmem:[%s1446_s26] sm:$0xff]  ;;  %v870_v4 = vld [vmem:[%s1446_s26 + $0x10] sm:$0xff]  ;;  %s880_s15 = sadd.s32 1, %s1450_s11  ;;  %v874_v6 = vld [vmem:[%s1446_s26 + $0x8] sm:$0xff]  ;;  %s862_s14 = sadd.s32 1, %s1454_s14   ;;  %s1454_s14 = sphi %s1759_s14, %s862_s14   ;;  %s1450_s11 = sphi %s1757_s11, %s1823_s11   ;;  %s1446_s26 = sphi %s1822_s26, %s885_s26   ;;  %s1442_s25 = sphi %s1821_s25, %s886_s25  }
 0x260   : >> { %v872_v5 = vld [vmem:[%s1446_s26 + $0x20] sm:$0xff]  ;;  %869 = vst [vmem:[%s1442_s25] sm:$0xff] %v868_v3  ;;  %871 = vst [vmem:[%s1442_s25 + $0x10] sm:$0xff] %v870_v4  ;;  %v876_v7 = vld [vmem:[%s1446_s26 + $0x18] sm:$0xff]  ;;  %p881_p3 = scmp.ge.s32.totalorder %s880_s15, %s1748_s10  ;;  %p861_p4 = scmp.ge.s32.totalorder %s862_s14, %s1748_s10 }
 0x261   : >> { %873 = vst [vmem:[%s1442_s25 + $0x20] sm:$0xff] %v872_v5  ;;  %v878_v15 = vld [vmem:[%s1446_s26 + $0x28] sm:$0xff]  ;;  %875 = vst [vmem:[%s1442_s25 + $0x8] sm:$0xff] %v874_v6 }
 0x262   : >> { %877 = vst [vmem:[%s1442_s25 + $0x18] sm:$0xff] %v876_v7  ;;  %879 = vst [vmem:[%s1442_s25 + $0x28] sm:$0xff] %v878_v15  ;;  %s1841_s15 = smov (%p881_p3, %s880_s15), 0  ;;  %864 = sbr.rel (!%p861_p4) target bundleno = 607 (0x25f), region = 135 }
 0x263   : >> { %s883_s23 = smul.u32 48, %s1841_s15  ;;  %s1823_s11 = smov %s1841_s15 }
 0x265   : >> { %s885_s26 = scalar_lea.vmem %s1616_s16, %s883_s23 [#allocation7]   ;;  %s886_s25 = scalar_lea.vmem %s1742_s9, %s883_s23  }
 0x267 PF: > { %1320 = sdivrem.u32 %s1839_s2, 3 }
 0x268   : > { %s1084_s17 = smul.u32 48, %s1748_s10 }
 0x26a   : > { %s1780_s19 = scalar_lea.vmem %s1616_s16, %s1084_s17 [#allocation7]   ;;  %s1783_s20 = scalar_lea.vmem %s1742_s9, %s1084_s17  }
 0x270   : > { %s1321_s21 = spop.drf %1320 }
 0x271   : > { %p1086_p6 = scmp.le.s32.totalorder %s1321_s21, 0 }
 0x272   : > { %s1456_s22 = smov (!%p1086_p6), %s1783_s20   ;;  %s1460_s8 = smov (!%p1086_p6), %s1780_s19  }
 0x273   : > { %989 = sbr.rel (%p1086_p6) target bundleno = 640 (0x280), region = 140  ;;  %s1464_s13 = smov (!%p1086_p6), 0  }
 0x274   : > { %s1468_s12 = smov (!%p1086_p6), 0  }
 0x278 LB: >> { %v903_v8 = vld [vmem:[%s1462_s8] sm:$0xff]  ;;  %v905_v9 = vld [vmem:[%s1462_s8 + $0x8] sm:$0xff]  ;;  %s907_s16 = sadd.s32 1, %s1466_s13  ;;  %s897_s12 = sadd.s32 1, %s1470_s12   ;;  %s1470_s12 = sphi %s1468_s12, %s897_s12   ;;  %s1466_s13 = sphi %s1464_s13, %s1465_s13   ;;  %s1462_s8 = sphi %s1460_s8, %s912_s8   ;;  %s1458_s22 = sphi %s1456_s22, %s913_s22  }
 0x279   : >> { %904 = vst [vmem:[%s1458_s22] sm:$0xff] %v903_v8  ;;  %906 = vst [vmem:[%s1458_s22 + $0x8] sm:$0xff] %v905_v9  ;;  %p908_p9 = scmp.ge.s32.totalorder %s907_s16, %s1321_s21  ;;  %p896_p10 = scmp.ge.s32.totalorder %s897_s12, %s1321_s21 }
 0x27b   : >> { %s1843_s16 = smov (%p908_p9, %s907_s16), 0  ;;  %899 = sbr.rel (!%p896_p10) target bundleno = 632 (0x278), region = 146 }
 0x27c   : >> { %s1087_s2 = sshll.u32 %s1843_s16, 4  ;;  %s1465_s13 = smov %s1843_s16  }
 0x27d   : >> { %s912_s8 = scalar_lea.vmem %s1780_s19, %s1087_s2 [#allocation7]   ;;  %s913_s22 = scalar_lea.vmem %s1783_s20, %s1087_s2  }
 0x280 PF: > { %s19_s29 = sadd.s32 1, %s1438_s29   ;;  %s1824_s23 = smov %s1418_s24 }
 0x281   : > { %p16_p11 = scmp.ge.s32.totalorder %s19_s29, 8   ;;  %s1825_s24 = smov %s1590_s18 }
 0x282   : > { %s1826_s25 = smov %s1430_s27  ;;  %s1827_s26 = smov %s1434_s28 }
 0x283   : > { %s1828_s27 = smov %s1831_s30  ;;  %s1829_s28 = smov %s1835_s7 }
 0x284   :  { %18 = sbr.rel (!%p16_p11) target bundleno = 6 (0x6), region = 157 }
 0x289   :  { %941 = vsyncpa [#allocation6], 1 }
 0x28a   :  { %943 = vsyncpa [#allocation6 + $0x1], 1 }

</bundles_post_ra>
